<compile_context>
chip_gen: v7x
topology: tpu7x:2x2x1
jax: 0.10.0
libtpu: 0.0.40
codegen_flags: <defaults>
</compile_context>

<pallas_src>
import functools

import jax
import jax.numpy as jnp
from jax.experimental import pallas as pl
from jax.experimental.pallas import tpu as pltpu


def _edge_qkv_attn_kernel(x_ref, wqkv_ref, wproj_ref, o_ref, *,
                          heads, head_dim, block_q):
    """One grid step = one (batch b, query tile j).

    x_ref:     (1, C, N)   channels x tokens for batch b
    wqkv_ref:  (3C, C)     fused QKV weight (q rows pre-scaled by head_dim^-0.5)
    wproj_ref: (C, C)      output projection weight
    o_ref:     (1, C, TQ)  output tile (channels x query tokens)
    """
    C = heads * head_dim
    j = pl.program_id(1)

    x = x_ref[0]                                               # (C, N)
    q_start = pl.multiple_of(j * block_q, block_q)
    xq = x_ref[0, :, pl.ds(q_start, block_q)]                  # (C, TQ)

    w_qkv = wqkv_ref[...]                                      # (3C, C)
    wq_s = w_qkv[:C]                                           # (C, C), scale folded
    wkv = w_qkv[C:]                                            # (2C, C)
    wproj = wproj_ref[...]                                     # (C, C)

    # Fused, lane-dense 1x1-conv projections (channel matmuls).
    # q for this query tile only, tokens-major for the score matmul.
    q_all = jnp.dot(wq_s, xq, preferred_element_type=jnp.float32).T    # (TQ, C)
    # k and v for all tokens / all heads at once, channels-major (lane dim = N).
    kv_t = jnp.dot(wkv, x, preferred_element_type=jnp.float32)         # (2C, N)

    out_t = jnp.zeros((C, block_q), dtype=jnp.float32)         # (C, TQ), lives in vregs
    for h in range(heads):                                     # heads is small & static
        qh = q_all[:, h * head_dim:(h + 1) * head_dim]         # (TQ, hd)
        kh_t = kv_t[h * head_dim:(h + 1) * head_dim]           # (hd, N)
        vh_t = kv_t[C + h * head_dim:C + (h + 1) * head_dim]   # (hd, N)

        # scores (scale already folded into wq_s); softmax over the key axis.
        s = jnp.dot(qh, kh_t, preferred_element_type=jnp.float32)       # (TQ, N)
        m = jnp.max(s, axis=-1, keepdims=True)                          # (TQ, 1)
        p = jnp.exp(s - m)                                              # (TQ, N)
        l = jnp.sum(p, axis=-1, keepdims=True)                          # (TQ, 1)
        # TODO(synk): attn_drop (nn.Dropout(0.1)) is identity in eval mode; not applied.

        # Unnormalized context; normalization deferred past the matmul.
        ctx = jax.lax.dot_general(p, vh_t, (((1,), (1,)), ((), ())),
                                  preferred_element_type=jnp.float32)   # (TQ, hd)
        ctx = ctx * pl.reciprocal(l, approx=False)                      # (TQ, hd)

        # Per-head slice of the projection, accumulated into the lane-dense
        # (C, TQ) output (output width is TQ lanes, not head_dim).
        wp_h = wproj[:, h * head_dim:(h + 1) * head_dim]                # (C, hd)
        out_t = out_t + jax.lax.dot_general(
            wp_h, ctx, (((1,), (1,)), ((), ())),
            preferred_element_type=jnp.float32)                         # (C, TQ)

    o_ref[0] = out_t.astype(o_ref.dtype)
    # TODO(synk): for very large N, stream K/V blocks with online (flash-style)
    # softmax instead of materializing the (block_q, N) score tile.


def _choose_block_q(n):
    if n <= 512:
        return n
    for t in (512, 256, 128):
        if n % t == 0:
            return t
    return n


def edge_qkv_attention(x_nchw, w_qkv, w_proj, heads, *, block_q=None):
    """Pallas implementation of EdgeQKVAttention.forward (eval mode).

    x_nchw : (B, C, H, W) float32
    w_qkv  : (3*C, C)  == nn.Conv2d(C, 3C, 1, bias=False).weight[:, :, 0, 0]
    w_proj : (C, C)    == nn.Conv2d(C, C, 1, bias=False).weight[:, :, 0, 0]
    """
    B, C, H, W = x_nchw.shape
    assert C % heads == 0, "dim should be divisible by heads"
    N = H * W
    hd = C // heads
    scale = float(hd) ** -0.5

    if block_q is None:
        block_q = _choose_block_q(N)
    assert N % block_q == 0
    assert block_q == N or block_q % 128 == 0, "query tile must be lane-aligned"
    n_q_tiles = N // block_q

    # NCHW -> (B, C, N): free reshape, no HBM transpose.
    x_cn = x_nchw.reshape(B, C, N)

    # Fuse the attention scale into the q rows of the QKV weight at trace time.
    w_qkv_f32 = w_qkv.astype(jnp.float32)
    w_qkv_fused = jnp.concatenate([w_qkv_f32[:C] * scale, w_qkv_f32[C:]], axis=0)
    w_proj_f32 = w_proj.astype(jnp.float32)

    kernel = functools.partial(_edge_qkv_attn_kernel, heads=heads,
                               head_dim=hd, block_q=block_q)

    flops = B * (2 * N * C * C                    # q projection
                 + n_q_tiles * 4 * N * C * C      # k/v projection (per q tile)
                 + 4 * N * N * C                  # scores + p@v over all heads
                 + 2 * N * C * C)                 # output projection
    cost = pl.CostEstimate(flops=int(flops),
                           transcendentals=int(B * heads * N * N),
                           bytes_accessed=int(4 * (2 * B * C * N + 4 * C * C)))

    vmem_est = 4 * (4 * C * N + 6 * C * block_q + 8 * C * C + 3 * block_q * N)
    vmem_limit = int(min(64 * 1024 * 1024, max(2 * vmem_est, 32 * 1024 * 1024)))

    out_cn = pl.pallas_call(
        kernel,
        out_shape=jax.ShapeDtypeStruct((B, C, N), x_nchw.dtype),
        grid=(B, n_q_tiles),
        in_specs=[
            pl.BlockSpec((1, C, N), lambda b, j: (b, 0, 0)),    # x (full token range)
            pl.BlockSpec((3 * C, C), lambda b, j: (0, 0)),      # fused QKV weight
            pl.BlockSpec((C, C), lambda b, j: (0, 0)),          # proj weight
        ],
        out_specs=pl.BlockSpec((1, C, block_q), lambda b, j: (b, 0, j)),
        compiler_params=pltpu.CompilerParams(
            dimension_semantics=("parallel", "parallel"),
            vmem_limit_bytes=vmem_limit),
        cost_estimate=cost,
    )(x_cn, w_qkv_fused, w_proj_f32)

    # (B, C, N) -> (B, C, H, W): free reshape, no HBM transpose.
    return out_cn.reshape(B, C, H, W)


def edge_qkv_attention_reference(x, w_qkv, w_proj, heads):
    """Pure-JAX reference matching the PyTorch forward (eval mode)."""
    B, C, H, W = x.shape
    N = H * W
    hd = C // heads
    scale = float(hd) ** -0.5
    qkv = jnp.einsum('bchw,oc->bohw', x, w_qkv)                 # 1x1 conv
    qkv = qkv.reshape(B, 3, heads, hd, N).transpose(1, 0, 2, 4, 3)
    q, k, v = qkv[0], qkv[1], qkv[2]                            # (B, heads, N, hd)
    attn = (q @ jnp.swapaxes(k, -2, -1)) * scale                # (B, heads, N, N)
    attn = jax.nn.softmax(attn, axis=-1)
    out = (attn @ v).transpose(0, 1, 3, 2).reshape(B, C, H, W)
    out = jnp.einsum('bchw,oc->bohw', out, w_proj)              # 1x1 conv
    return out


if __name__ == "__main__":
    key = jax.random.PRNGKey(0)

    configs = [
        # (B, C, H, W, heads, block_q)
        (2, 8, 16, 16, 2, None),   # single query tile per batch, grid (2, 1)
        (1, 16, 16, 16, 4, 128),   # two query tiles per batch, grid (1, 2)
    ]
    for (B, C, H, W, heads, block_q) in configs:
        k1, k2, k3, key = jax.random.split(key, 4)
        x = jax.random.normal(k1, (B, C, H, W), dtype=jnp.float32)
        # Deterministic parameter init (Conv2d 1x1, bias=False -> (out_c, in_c))
        w_qkv = jax.random.normal(k2, (3 * C, C), dtype=jnp.float32) * (C ** -0.5)
        w_proj = jax.random.normal(k3, (C, C), dtype=jnp.float32) * (C ** -0.5)

        out = edge_qkv_attention(x, w_qkv, w_proj, heads, block_q=block_q)
        out = jax.block_until_ready(out)

        ref = edge_qkv_attention_reference(x, w_qkv, w_proj, heads)
        assert out.shape == (B, C, H, W), out.shape
        max_err = float(jnp.max(jnp.abs(out - ref)))
        # f32 everywhere; tolerance covers differing contraction/accumulation order.
        assert jnp.allclose(out, ref, atol=1e-3, rtol=1e-3), max_err

    print("KERNEL_OK")
</pallas_src>

<mosaic_0001>
module attributes {stable_mosaic.version = 11 : i64} {
  func.func @_edge_qkv_attn_kernel(%arg0: i32, %arg1: i32, %arg2: memref<1x8x256xf32, #tpu.memory_space<vmem>>, %arg3: memref<24x8xf32, #tpu.memory_space<vmem>>, %arg4: memref<8x8xf32, #tpu.memory_space<vmem>>, %arg5: memref<1x8x256xf32, #tpu.memory_space<vmem>>) attributes {dimension_semantics = [#tpu.dimension_semantics<parallel>, #tpu.dimension_semantics<parallel>], iteration_bounds = array<i64: 2, 1>, scalar_prefetch = 0 : i64, scratch_operands = 0 : i64, tpu.core_type = #tpu.core_type<tc>, window_params = [{transform_indices = @transform_0, window_bounds = array<i64: 1, 8, 256>}, {pipeline_mode = #tpu.pipeline_mode<synchronous>, transform_indices = @transform_1, window_bounds = array<i64: 24, 8>}, {pipeline_mode = #tpu.pipeline_mode<synchronous>, transform_indices = @transform_2, window_bounds = array<i64: 8, 8>}, {transform_indices = @transform_3, window_bounds = array<i64: 1, 8, 256>}]} {
    %c0 = arith.constant 0 : index
    %c0_0 = arith.constant 0 : index
    %c0_1 = arith.constant 0 : index
    %0 = vector.load %arg2[%c0, %c0_0, %c0_1] : memref<1x8x256xf32, #tpu.memory_space<vmem>>, vector<1x8x256xf32>
    %1 = vector.shape_cast %0 : vector<1x8x256xf32> to vector<8x256xf32>
    %c256_i32 = arith.constant 256 : i32
    %2 = arith.muli %arg1, %c256_i32 : i32
    %3 = tpu.assume_multiple %2, 256 : i32
    %c0_2 = arith.constant 0 : index
    %c0_3 = arith.constant 0 : index
    %4 = arith.index_cast %3 : i32 to index
    %5 = vector.load %arg2[%c0_2, %c0_3, %4] : memref<1x8x256xf32, #tpu.memory_space<vmem>>, vector<1x8x256xf32>
    %6 = vector.shape_cast %5 : vector<1x8x256xf32> to vector<8x256xf32>
    %c0_4 = arith.constant 0 : index
    %c0_5 = arith.constant 0 : index
    %7 = vector.load %arg3[%c0_4, %c0_5] : memref<24x8xf32, #tpu.memory_space<vmem>>, vector<24x8xf32>
    %8 = vector.extract_strided_slice %7 {offsets = [0, 0], sizes = [8, 8], strides = [1, 1]} : vector<24x8xf32> to vector<8x8xf32>
    %9 = vector.extract_strided_slice %7 {offsets = [8, 0], sizes = [16, 8], strides = [1, 1]} : vector<24x8xf32> to vector<16x8xf32>
    %c0_6 = arith.constant 0 : index
    %c0_7 = arith.constant 0 : index
    %10 = vector.load %arg4[%c0_6, %c0_7] : memref<8x8xf32, #tpu.memory_space<vmem>>, vector<8x8xf32>
    %cst = arith.constant dense<0.000000e+00> : vector<8x256xf32>
    %11 = tpu.matmul %8, %6, %cst {dimension_numbers = #tpu.dot_dimension_numbers<[1], [0], [0], [1], [0, 0, 1, 1], [], []>} : vector<8x8xf32>, vector<8x256xf32>, vector<8x256xf32> -> vector<8x256xf32>
    %12 = tpu.transpose %11, [1, 0] : vector<8x256xf32> -> vector<256x8xf32>
    %cst_8 = arith.constant dense<0.000000e+00> : vector<16x256xf32>
    %13 = tpu.matmul %9, %1, %cst_8 {dimension_numbers = #tpu.dot_dimension_numbers<[1], [0], [0], [1], [0, 0, 1, 1], [], []>} : vector<16x8xf32>, vector<8x256xf32>, vector<16x256xf32> -> vector<16x256xf32>
    %cst_9 = arith.constant 0.000000e+00 : f32
    %14 = vector.broadcast %cst_9 : f32 to vector<8x256xf32>
    %15 = vector.extract_strided_slice %12 {offsets = [0, 0], sizes = [256, 4], strides = [1, 1]} : vector<256x8xf32> to vector<256x4xf32>
    %16 = vector.extract_strided_slice %13 {offsets = [0, 0], sizes = [4, 256], strides = [1, 1]} : vector<16x256xf32> to vector<4x256xf32>
    %17 = vector.extract_strided_slice %13 {offsets = [8, 0], sizes = [4, 256], strides = [1, 1]} : vector<16x256xf32> to vector<4x256xf32>
    %cst_10 = arith.constant dense<0.000000e+00> : vector<256x256xf32>
    %18 = tpu.matmul %15, %16, %cst_10 {dimension_numbers = #tpu.dot_dimension_numbers<[1], [0], [0], [1], [0, 0, 1, 1], [], []>} : vector<256x4xf32>, vector<4x256xf32>, vector<256x256xf32> -> vector<256x256xf32>
    %cst_11 = arith.constant dense<0xFF800000> : vector<256xf32>
    %19 = vector.multi_reduction <maximumf>, %18, %cst_11 [1] : vector<256x256xf32> to vector<256xf32>
    %20 = vector.shape_cast %19 : vector<256xf32> to vector<256x1xf32>
    %21 = vector.broadcast %20 : vector<256x1xf32> to vector<256x256xf32>
    %22 = arith.subf %18, %21 : vector<256x256xf32>
    %23 = math.exp %22 : vector<256x256xf32>
    %cst_12 = arith.constant dense<0.000000e+00> : vector<256xf32>
    %24 = vector.multi_reduction <add>, %23, %cst_12 [1] : vector<256x256xf32> to vector<256xf32>
    %25 = vector.shape_cast %24 : vector<256xf32> to vector<256x1xf32>
    %cst_13 = arith.constant dense<0.000000e+00> : vector<256x4xf32>
    %26 = tpu.matmul %23, %17, %cst_13 {dimension_numbers = #tpu.dot_dimension_numbers<[1], [1], [0], [0], [0, 0, 1, 0], [], []>} : vector<256x256xf32>, vector<4x256xf32>, vector<256x4xf32> -> vector<256x4xf32>
    %27 = tpu.reciprocal %25 : vector<256x1xf32> -> vector<256x1xf32>
    %28 = vector.broadcast %27 : vector<256x1xf32> to vector<256x4xf32>
    %29 = arith.mulf %26, %28 : vector<256x4xf32>
    %30 = vector.extract_strided_slice %10 {offsets = [0, 0], sizes = [8, 4], strides = [1, 1]} : vector<8x8xf32> to vector<8x4xf32>
    %cst_14 = arith.constant dense<0.000000e+00> : vector<8x256xf32>
    %31 = tpu.matmul %30, %29, %cst_14 {dimension_numbers = #tpu.dot_dimension_numbers<[1], [1], [0], [0], [0, 0, 1, 0], [], []>} : vector<8x4xf32>, vector<256x4xf32>, vector<8x256xf32> -> vector<8x256xf32>
    %32 = arith.addf %14, %31 : vector<8x256xf32>
    %33 = vector.extract_strided_slice %12 {offsets = [0, 4], sizes = [256, 4], strides = [1, 1]} : vector<256x8xf32> to vector<256x4xf32>
    %34 = vector.extract_strided_slice %13 {offsets = [4, 0], sizes = [4, 256], strides = [1, 1]} : vector<16x256xf32> to vector<4x256xf32>
    %35 = vector.extract_strided_slice %13 {offsets = [12, 0], sizes = [4, 256], strides = [1, 1]} : vector<16x256xf32> to vector<4x256xf32>
    %cst_15 = arith.constant dense<0.000000e+00> : vector<256x256xf32>
    %36 = tpu.matmul %33, %34, %cst_15 {dimension_numbers = #tpu.dot_dimension_numbers<[1], [0], [0], [1], [0, 0, 1, 1], [], []>} : vector<256x4xf32>, vector<4x256xf32>, vector<256x256xf32> -> vector<256x256xf32>
    %cst_16 = arith.constant dense<0xFF800000> : vector<256xf32>
    %37 = vector.multi_reduction <maximumf>, %36, %cst_16 [1] : vector<256x256xf32> to vector<256xf32>
    %38 = vector.shape_cast %37 : vector<256xf32> to vector<256x1xf32>
    %39 = vector.broadcast %38 : vector<256x1xf32> to vector<256x256xf32>
    %40 = arith.subf %36, %39 : vector<256x256xf32>
    %41 = math.exp %40 : vector<256x256xf32>
    %cst_17 = arith.constant dense<0.000000e+00> : vector<256xf32>
    %42 = vector.multi_reduction <add>, %41, %cst_17 [1] : vector<256x256xf32> to vector<256xf32>
    %43 = vector.shape_cast %42 : vector<256xf32> to vector<256x1xf32>
    %cst_18 = arith.constant dense<0.000000e+00> : vector<256x4xf32>
    %44 = tpu.matmul %41, %35, %cst_18 {dimension_numbers = #tpu.dot_dimension_numbers<[1], [1], [0], [0], [0, 0, 1, 0], [], []>} : vector<256x256xf32>, vector<4x256xf32>, vector<256x4xf32> -> vector<256x4xf32>
    %45 = tpu.reciprocal %43 : vector<256x1xf32> -> vector<256x1xf32>
    %46 = vector.broadcast %45 : vector<256x1xf32> to vector<256x4xf32>
    %47 = arith.mulf %44, %46 : vector<256x4xf32>
    %48 = vector.extract_strided_slice %10 {offsets = [0, 4], sizes = [8, 4], strides = [1, 1]} : vector<8x8xf32> to vector<8x4xf32>
    %cst_19 = arith.constant dense<0.000000e+00> : vector<8x256xf32>
    %49 = tpu.matmul %48, %47, %cst_19 {dimension_numbers = #tpu.dot_dimension_numbers<[1], [1], [0], [0], [0, 0, 1, 0], [], []>} : vector<8x4xf32>, vector<256x4xf32>, vector<8x256xf32> -> vector<8x256xf32>
    %50 = arith.addf %32, %49 : vector<8x256xf32>
    %c0_20 = arith.constant 0 : index
    %c0_21 = arith.constant 0 : index
    %c0_22 = arith.constant 0 : index
    %51 = vector.load %arg5[%c0_20, %c0_21, %c0_22] : memref<1x8x256xf32, #tpu.memory_space<vmem>>, vector<1x8x256xf32>
    %52 = vector.shape_cast %51 : vector<1x8x256xf32> to vector<8x256xf32>
    %53 = vector.shape_cast %50 : vector<8x256xf32> to vector<1x8x256xf32>
    tpu.vector_store %arg5[%c0_20, %c0_21, %c0_22], %53 {strides = array<i32>} : memref<1x8x256xf32, #tpu.memory_space<vmem>>, vector<1x8x256xf32>,
    return
  }
  func.func @transform_0(%arg0: i32, %arg1: i32) -> (i32, i32, i32) {
    %c0_i32 = arith.constant 0 : i32
    %c0_i32_0 = arith.constant 0 : i32
    %c0_i32_1 = arith.constant 0 : i32
    return %arg0, %c0_i32, %c0_i32_0 : i32, i32, i32
  }
  func.func @transform_1(%arg0: i32, %arg1: i32) -> (i32, i32) {
    %c0_i32 = arith.constant 0 : i32
    %c0_i32_0 = arith.constant 0 : i32
    %c0_i32_1 = arith.constant 0 : i32
    return %c0_i32, %c0_i32_0 : i32, i32
  }
  func.func @transform_2(%arg0: i32, %arg1: i32) -> (i32, i32) {
    %c0_i32 = arith.constant 0 : i32
    %c0_i32_0 = arith.constant 0 : i32
    %c0_i32_1 = arith.constant 0 : i32
    return %c0_i32, %c0_i32_0 : i32, i32
  }
  func.func @transform_3(%arg0: i32, %arg1: i32) -> (i32, i32, i32) {
    %c0_i32 = arith.constant 0 : i32
    %c0_i32_0 = arith.constant 0 : i32
    return %arg0, %c0_i32, %arg1 : i32, i32, i32
  }
}

</mosaic_0001>

<bundles_post_ra>
// kernel: tpu_custom_call.1
= control target key start
LH: loop header
LB: loop body
LE: loop exit
PB: predicated region body
PF: predicated region fallthrough
CT: control target
= control target key end

     0   :  { %8 = vsyncpa [#allocation3], 0  ;;  %s5162_s0 = inlined_call_operand.vmem [shape: f32[2,8,256], index: 0, kind: input, shape index: {}]   ;;  %s5163_s1 = inlined_call_operand.vmem [shape: f32[24,8], index: 1, kind: input, shape index: {}]   ;;  %s5164_s2 = inlined_call_operand.hbm [shape: f32[8,8], index: 2, kind: input, shape index: {}]   ;;  %s5165_s3 = inlined_call_operand.hbm [shape: f32[2,8,256], index: 3, kind: output, shape index: {}]  }
   0x1   :  { %9 = vsyncpa [#allocation4], 0 }
   0x2   :  { %11 = vsyncpa [#allocation4 + $0x1], 0  ;;  %s3888_s12 = smov 0   ;;  %s3890_s13 = smov 0  }
   0x3   :  { %s3892_s14 = smov 0   ;;  %s3894_s15 = smov 0  }
   0x4   :  { %s3896_s16 = smov 0   ;;  %s3898_s17 = smov 0  }
   0x5 LB: > { %s2980_s18 = sadd.s32 4294967295, %s3862_s17   ;;  %s2981_s19 = sadd.s32 4294967294, %s3862_s17   ;;  %s3862_s17 = sphi %s3898_s17, %s17_s17   ;;  %s3858_s16 = sphi %s3896_s16, %s5341_s16   ;;  %s3854_s15 = sphi %s3894_s15, %s5340_s15   ;;  %s3850_s14 = sphi %s3892_s14, %s5339_s14   ;;  %s3846_s13 = sphi %s3890_s13, %s5338_s13   ;;  %s3842_s12 = sphi %s3888_s12, %s5337_s12  }
   0x6   : > { %s29_s20 = sadd.s32 1, %s3858_s16  ;;  %s106_s21 = sadd.s32 1, %s3850_s14 }
   0x7   : > { %p31_p0 = scmp.ge.s32.totalorder %s29_s20, 2  ;;  %p116_p1 = scmp.ne.s32.totalorder %s3850_s14, %s3846_s13 }
   0x8   : > { %p117_p2 = scmp.eq.s32.totalorder %s2980_s18, 1  ;;  %p122_p3 = scmp.ne.s32.totalorder %s3846_s13, %s3842_s12 }
   0x9   : > { %s5343_s20 = smov (%p31_p0, %s29_s20), 0  ;;  %p123_p5 = scmp.eq.s32.totalorder %s2981_s19, 1 }
   0xa   : > { %p3928_p4 = por %p117_p2, %p116_p1  ;;  %s101_s23 = ssub.s32 %s3858_s16, %s5343_s20 }
   0xb   : > { %p2982_p6 = scmp.ge.s32.totalorder %s3862_s17, 1  ;;  %p104_p7 = scmp.eq.s32.totalorder %s101_s23, 0 }
   0xc   : > { %s5218_s22 = scalar_select %p3928_p4, 1, 0 }
   0xd   : > { %p3935_p8 = por %p123_p5, %p122_p3  ;;  %p130_p9 = scmp.lt.s32.totalorder %s3862_s17, 3 }
   0xe   : > { %s3941_s25 = scalar_select %p104_p7, %s3850_s14, %s106_s21  }
   0xf   : > { %s5219_s24 = scalar_select %p3935_p8, 1, 0 }
  0x10   : > { %p3943_p10 = pnand %p2982_p6, %p130_p9  ;;  %p3947_p11 = scmp.eq.s32.totalorder %s2980_s18, 0 }
  0x11   : > { %s3864_s28 = smov [#allocation2]   ;;  %s3752_s6 = scalar_lea.hbm %s5164_s2, 128 }
  0x12   : > { %s5220_s26 = scalar_select %p3943_p10, 1, 0 }
  0x13   : > { %s5221_s27 = scalar_select %p3947_p11, 1, 0 }
  0x14   : > { %p3306_p12 = pneg %p3943_p10  ;;  %s146_s29 = sshll.u32 %s3864_s28, 4  ;;  %s147_s29 = int_to_ptr.vmem [resolvable:$true] %s146_s29 }
  0x15   : > { %p3753_p0 = scmp.ne.s32.totalorder %s5164_s2, %s3752_s6  ;;  %p3759_p5 = scmp.lt.u32.totalorder %s3752_s6, %s5164_s2 }
  0x16   : > { %p3955_p13 = pnand %p3947_p11, %p3306_p12 }
  0x18   : > { %p3754_p1 = pneg %p3955_p13 }
  0x1a   : > { %p3755_p2 = pnand %p3754_p1, %p3753_p0 }
  0x1c   : > { %p3756_p3 = pneg %p3755_p2 }
  0x1e   : > { %p3761_p6 = pnand %p3759_p5, %p3756_p3 }
  0x20   : > { %3764 = shalt.err (!%p3761_p6)
}
  0x21   : > { %s3765_s11 = scalar_lea.vmem %s147_s29, 128  ;;  %p3773_p8 = scmp.lt.s32.totalorder %s147_s29, %s147_s29 }
  0x22   : > { %p3766_p7 = scmp.ne.s32.totalorder %s147_s29, %s3765_s11  ;;  %p3774_p4 = scmp.lt.s32.totalorder %s3765_s11, %s3765_s11 }
  0x24   : > { %p3768_p9 = pnand %p3766_p7, %p3754_p1  ;;  %p3775_p11 = por %p3774_p4, %p3773_p8 }
  0x26   : > { %p3769_p12 = pneg %p3768_p9 }
  0x28   : > { %p3776_p10 = pnand %p3775_p11, %p3769_p12 }
  0x2a   : > { %3779 = shalt.err (!%p3776_p10)
}
  0x2b   : > { %3309 = dma.hbm_to_vmem [thread:$0]  (!%p3955_p13), %s5164_s2, 128, %s147_s29, [#allocation3]  }
  0x2c   : > { %p5223_p0 = scmp.ne.s32.totalorder %s5220_s26, 0 }
  0x2e   : > { %167 = sbr.rel (%p5223_p0) target bundleno = 1487 (0x5cf), region = 32 }
  0x35   : > { %p5224_p2 = scmp.ne.s32.totalorder %s5221_s27, 0 }
  0x37   : > { %3833 = dma.done.wait (%p5224_p2), [#allocation3], 128  }
  0x38   : > { %3835 = vsyncadd (%p5224_p2), [#allocation3], 4294967168  ;;  %p191_p4 = scmp.lt.s32.totalorder %s3854_s15, 1  ;;  %v3865_v0 = vmov 0.0   ;;  %v206_v3 = vld [vmem:[%s5163_s1] sm:$0xff]  ;;  %vm210_vm0 = vcmask 64512  }
  0x39   : > { %278 = vmatprep.mubr.f32.mxu0 %v3865_v0  ;;  %419 = vmatprep.mubr.f32.mxu1 %v3865_v0  ;;  %v207_v4 = vld [vmem:[%s5163_s1 + $0x8] sm:$0xff]  ;;  %vm529_vm1 = vcmask 1043456   ;;  %vm432_vm2 = vcmask 31744   ;;  %s3866_s6 = smov 124   ;;  %v208_v18 = vld [vmem:[%s5163_s1 + $0x10] sm:$0xff]  ;;  %s188_s9 = sand.u32 1, %s3846_s13  }
  0x3a   : > { %s192_s21 = scalar_select %p191_p4, %s3854_s15, 1  ;;  %vm4880_vm3 = vmpackc.low %vm432_vm2, %vm432_vm2 }
  0x3b   : > { %s2987_s10 = sshll.u32 %s188_s9, 4  ;;  %s3133_s11 = sshll.u32 %s3854_s15, 8 }
  0x3c   : > { %s3132_s23 = sshll.u32 %s192_s21, 4  ;;  %s190_s18 = scalar_lea.vmem [#allocation5], %s2987_s10 }
  0x3d   : > { %s195_s26 = scalar_lea.vmem %s5162_s0, %s3132_s23  ;;  %s2896_s19 = sshll.u32 %s190_s18, 4  ;;  %s5117_s19 = int_to_ptr.vmem [resolvable:$true] %s2896_s19 }
  0x3e   : > { %v205_v1 = vld [vmem:[%s195_s26 + $0x8] sm:$0xff]  ;;  %v204_v2 = vld [vmem:[%s195_s26] sm:$0xff]  ;;  %s5115_s28 = scalar_lea.hbm %s5165_s3, %s3133_s11  ;;  %s2880_s29 = scalar_lea.sflag [#allocation4], %s188_s9 }
  0x3f   : > { %214 = vmatprep.subr.mxu0 %v205_v1  ;;  %355 = vmatprep.subr.mxu1 %v205_v1  ;;  %s3780_s15 = scalar_lea.vmem %s5117_s19, 256  ;;  %p5335_p10 = scmp.ne.s32.totalorder %s5218_s22, 0 }
  0x40   : > { %215 = vmatpush1.msra.mxu0 %v204_v2  ;;  %356 = vmatpush1.msra.mxu1 %v204_v2  ;;  %p3781_p8 = scmp.ne.s32.totalorder %s5117_s19, %s3780_s15  ;;  %s3867_s26 = smov [#allocation5]  }
  0x41   : > { %2990 = vmatmul.mubr.msk.f32.vlgmr.msra.gmra.mrb[0].mxu0 %vm210_vm0, %v206_v3  ;;  %2991 = vmatmul.mubr.msk.f32.vlgmr.msra.gmra.mrb[0].mxu1 %vm210_vm0, %v207_v4  ;;  %s3784_s30 = sshll.u32 %s3867_s26, 4  ;;  %s3785_s30 = int_to_ptr.vmem [resolvable:$false] %s3784_s30 }
  0x42   : > { %600 = vmatprep.mubr.f32.mxu0 %v3865_v0  ;;  %425 = vmatprep.mubr.f32.mxu1 %v3865_v0  ;;  %p3782_p11 = pnand %p3781_p8, %p5335_p10  ;;  %s3786_s4 = scalar_lea.vmem %s3785_s30, 512 }
  0x43   : > { %p3787_p1 = scmp.lt.s32.totalorder %s5117_s19, %s3785_s30  ;;  %p3788_p3 = scmp.lt.s32.totalorder %s3786_s4, %s3780_s15 }
  0x44   : > { %p3783_p13 = pneg %p3782_p11 }
  0x45   : > { %2992 = vmatmul.mubr.msk.f32.gmra.mrb[2].mxu1 %vm210_vm0, %v208_v18  ;;  %p3789_p5 = por %p3788_p3, %p3787_p1 }
  0x47   : > { %p3790_p6 = pnand %p3789_p5, %p3783_p13 }
 0x114   : > { %v280_v5 = vpop.f32.mrb[0].mxu0  ;;  %v421_v6 = vpop.f32.mrb[0].mxu1 }
 0x115   : > { %285 = vxpose.xlu0.b32.start.end [1/1] (short) %v280_v5, 128  ;;  %v282_v7 = vpop.f32.mrb[1].mxu0  ;;  %v423_v8 = vpop.f32.mrb[1].mxu1  ;;  %v1530_v10 = vrot.slane %v421_v6, 4 }
 0x116   : > { %v1531_v9 = vrot.slane %v423_v8, 4  ;;  %2993 = vmatprep.subr.msk.mxu0 %vm529_vm1, %v423_v8 }
 0x117   : > { %2994 = vmatpush1.msk.msra.mxu0 %vm529_vm1, %v421_v6 }
 0x118   : > { %3027 = vmatprep.subr.msk.mxu0 %vm529_vm1, %v1531_v9 }
 0x152   : > { %317 = vxpose.xlu0.b32.start.end [1/1] (short) %v282_v7, 128 }
 0x195   : > { %v301_v11 = vpop.trf.xlu0 }
 0x196   : > { %1466 = vrot.lane.b32.xlu1 %v301_v11, %s3866_s6  ;;  %2995 = vmatmul.mubr.msk.f32.vlgmr.msra.gmra.mrb[2].mxu0 %vm432_vm2, %v301_v11 }
 0x197   : > { %3028 = vmatpush1.msk.msra.mxu0 %vm529_vm1, %v1530_v10  ;;  %606 = vmatprep.mubr.f32.mxu0 %v3865_v0 }
 0x199   : > { %v302_v12 = vpop.trf.xlu0 }
 0x19a   : > { %1468 = vrot.lane.b32.xlu1 %v302_v12, %s3866_s6  ;;  %2996 = vmatmul.mubr.msk.f32.gmra.mrb[4].mxu0 %vm432_vm2, %v302_v12 }
 0x19b   : > { %612 = vmatprep.mubr.f32.mxu0 %v3865_v0 }
 0x19d   : > { %v303_v13 = vpop.trf.xlu0 }
 0x19e   : > { %1470 = vrot.lane.b32.xlu1 %v303_v13, %s3866_s6  ;;  %2997 = vmatmul.mubr.msk.f32.gmra.mrb[6].mxu0 %vm432_vm2, %v303_v13 }
 0x19f   : > { %618 = vmatprep.mubr.f32.mxu0 %v3865_v0 }
 0x1a1   : > { %v304_v14 = vpop.trf.xlu0 }
 0x1a2   : > { %1472 = vrot.lane.b32.xlu1 %v304_v14, %s3866_s6  ;;  %2998 = vmatmul.mubr.msk.f32.gmra.mrb[8].mxu0 %vm432_vm2, %v304_v14 }
 0x1a3   : > { %624 = vmatprep.mubr.f32.mxu0 %v3865_v0 }
 0x1a5   : > { %v305_v15 = vpop.trf.xlu0 }
 0x1a6   : > { %1474 = vrot.lane.b32.xlu1 %v305_v15, %s3866_s6  ;;  %2999 = vmatmul.mubr.msk.f32.gmra.mrb[10].mxu0 %vm432_vm2, %v305_v15 }
 0x1a7   : > { %630 = vmatprep.mubr.f32.mxu0 %v3865_v0 }
 0x1a9   : > { %v306_v16 = vpop.trf.xlu0 }
 0x1aa   : > { %1476 = vrot.lane.b32.xlu1 %v306_v16, %s3866_s6  ;;  %3000 = vmatmul.mubr.msk.f32.gmra.mrb[12].mxu0 %vm432_vm2, %v306_v16 }
 0x1ab   : > { %636 = vmatprep.mubr.f32.mxu0 %v3865_v0 }
 0x1ad   : > { %v307_v17 = vpop.trf.xlu0 }
 0x1ae   : > { %1478 = vrot.lane.b32.xlu1 %v307_v17, %s3866_s6  ;;  %3001 = vmatmul.mubr.msk.f32.gmra.mrb[14].mxu0 %vm432_vm2, %v307_v17 }
 0x1af   : > { %642 = vmatprep.mubr.f32.mxu0 %v3865_v0 }
 0x1b1   : > { %v308_v19 = vpop.trf.xlu0 }
 0x1b2   : > { %1480 = vrot.lane.b32.xlu1 %v308_v19, %s3866_s6  ;;  %3002 = vmatmul.mubr.msk.f32.gmra.mrb[16].mxu0 %vm432_vm2, %v308_v19 }
 0x1b3   : > { %648 = vmatprep.mubr.f32.mxu0 %v3865_v0 }
 0x1b5   : > { %v309_v20 = vpop.trf.xlu0 }
 0x1b6   : > { %1482 = vrot.lane.b32.xlu1 %v309_v20, %s3866_s6  ;;  %3003 = vmatmul.mubr.msk.f32.gmra.mrb[18].mxu0 %vm432_vm2, %v309_v20 }
 0x1b7   : > { %654 = vmatprep.mubr.f32.mxu0 %v3865_v0 }
 0x1b9   : > { %v310_v21 = vpop.trf.xlu0 }
 0x1ba   : > { %1484 = vrot.lane.b32.xlu1 %v310_v21, %s3866_s6  ;;  %3004 = vmatmul.mubr.msk.f32.gmra.mrb[20].mxu0 %vm432_vm2, %v310_v21 }
 0x1bb   : > { %660 = vmatprep.mubr.f32.mxu0 %v3865_v0 }
 0x1bd   : > { %v311_v22 = vpop.trf.xlu0 }
 0x1be   : > { %1486 = vrot.lane.b32.xlu1 %v311_v22, %s3866_s6  ;;  %3005 = vmatmul.mubr.msk.f32.gmra.mrb[22].mxu0 %vm432_vm2, %v311_v22 }
 0x1bf   : > { %666 = vmatprep.mubr.f32.mxu0 %v3865_v0 }
 0x1c1   : > { %v312_v23 = vpop.trf.xlu0 }
 0x1c2   : > { %1488 = vrot.lane.b32.xlu1 %v312_v23, %s3866_s6  ;;  %3006 = vmatmul.mubr.msk.f32.gmra.mrb[24].mxu0 %vm432_vm2, %v312_v23 }
 0x1c3   : > { %672 = vmatprep.mubr.f32.mxu0 %v3865_v0 }
 0x1c5   : > { %v313_v24 = vpop.trf.xlu0 }
 0x1c6   : > { %1490 = vrot.lane.b32.xlu1 %v313_v24, %s3866_s6  ;;  %3007 = vmatmul.mubr.msk.f32.gmra.mrb[26].mxu0 %vm432_vm2, %v313_v24 }
 0x1c7   : > { %678 = vmatprep.mubr.f32.mxu0 %v3865_v0 }
 0x1c9   : > { %v314_v25 = vpop.trf.xlu0 }
 0x1ca   : > { %1492 = vrot.lane.b32.xlu1 %v314_v25, %s3866_s6  ;;  %3008 = vmatmul.mubr.msk.f32.gmra.mrb[28].mxu0 %vm432_vm2, %v314_v25 }
 0x1cb   : > { %684 = vmatprep.mubr.f32.mxu0 %v3865_v0 }
 0x1cd   : > { %v315_v26 = vpop.trf.xlu0 }
 0x1ce   : > { %1494 = vrot.lane.b32.xlu1 %v315_v26, %s3866_s6  ;;  %3009 = vmatmul.mubr.msk.f32.gmra.mrb[30].mxu0 %vm432_vm2, %v315_v26 }
 0x1cf   : > { %690 = vmatprep.mubr.f32.mxu0 %v3865_v0 }
 0x1d1   : > { %v316_v27 = vpop.trf.xlu0 }
 0x1d2   : > { %1496 = vrot.lane.b32.xlu1 %v316_v27, %s3866_s6  ;;  %3010 = vmatmul.mubr.msk.f32.gmra.mrb[32].mxu0 %vm432_vm2, %v316_v27 }
 0x1d3   : > { %696 = vmatprep.mubr.f32.mxu0 %v3865_v0 }
 0x1d5   : > { %v333_v28 = vpop.trf.xlu0 }
 0x1d6   : > { %1498 = vrot.lane.b32.xlu1 %v333_v28, %s3866_s6  ;;  %3011 = vmatmul.mubr.msk.f32.gmra.mrb[34].mxu0 %vm432_vm2, %v333_v28 }
 0x1d7   : > { %702 = vmatprep.mubr.f32.mxu0 %v3865_v0 }
 0x1d9   : > { %v334_v29 = vpop.trf.xlu0 }
 0x1da   : > { %1500 = vrot.lane.b32.xlu0 %v334_v29, %s3866_s6  ;;  %3012 = vmatmul.mubr.msk.f32.gmra.mrb[36].mxu0 %vm432_vm2, %v334_v29 }
 0x1db   : > { %708 = vmatprep.mubr.f32.mxu0 %v3865_v0 }
 0x1dd   : > { %v335_v30 = vpop.trf.xlu0 }
 0x1de   : > { %1502 = vrot.lane.b32.xlu1 %v335_v30, %s3866_s6  ;;  %3013 = vmatmul.mubr.msk.f32.gmra.mrb[38].mxu0 %vm432_vm2, %v335_v30 }
 0x1df   : > { %714 = vmatprep.mubr.f32.mxu0 %v3865_v0 }
 0x1e1   : > { %v336_v31 = vpop.trf.xlu0 }
 0x1e2   : > { %1504 = vrot.lane.b32.xlu1 %v336_v31, %s3866_s6  ;;  %3014 = vmatmul.mubr.msk.f32.gmra.mrb[40].mxu0 %vm432_vm2, %v336_v31 }
 0x1e3   : > { %720 = vmatprep.mubr.f32.mxu0 %v3865_v0 }
 0x1e5   : > { %v337_v32 = vpop.trf.xlu0 }
 0x1e6   : > { %1506 = vrot.lane.b32.xlu1 %v337_v32, %s3866_s6  ;;  %3015 = vmatmul.mubr.msk.f32.gmra.mrb[42].mxu0 %vm432_vm2, %v337_v32  ;;  %v4200_v32 = vpop.f32.mrb[2].mxu1 }
 0x1e7   : > { %726 = vmatprep.mubr.f32.mxu0 %v3865_v0 }
 0x1e9   : > { %v338_v33 = vpop.trf.xlu0 }
 0x1ea   : > { %1508 = vrot.lane.b32.xlu1 %v338_v33, %s3866_s6  ;;  %3016 = vmatmul.mubr.msk.f32.gmra.mrb[44].mxu0 %vm432_vm2, %v338_v33 }
 0x1eb   : > { %732 = vmatprep.mubr.f32.mxu0 %v3865_v0 }
 0x1ed   : > { %v339_v34 = vpop.trf.xlu0 }
 0x1ee   : > { %1510 = vrot.lane.b32.xlu1 %v339_v34, %s3866_s6  ;;  %3017 = vmatmul.mubr.msk.f32.gmra.mrb[46].mxu0 %vm432_vm2, %v339_v34  ;;  %v429_v34 = vpop.f32.mrb[3].mxu1 }
 0x1ef   : > { %738 = vmatprep.mubr.f32.mxu0 %v3865_v0  ;;  %1177 = vmatprep.subr.mxu1 %v429_v34 }
 0x1f0   : > { %1178 = vmatpush1.xpose.msra.mxu1 %v4200_v32 }
 0x1f1   : > { %v340_v35 = vpop.trf.xlu0 }
 0x1f2   : > { %1512 = vrot.lane.b32.xlu1 %v340_v35, %s3866_s6  ;;  %3018 = vmatmul.mubr.msk.f32.gmra.mrb[48].mxu0 %vm432_vm2, %v340_v35 }
 0x1f3   : > { %744 = vmatprep.mubr.f32.mxu0 %v3865_v0 }
 0x1f5   : > { %v341_v36 = vpop.trf.xlu0 }
 0x1f6   : > { %1514 = vrot.lane.b32.xlu1 %v341_v36, %s3866_s6  ;;  %3019 = vmatmul.mubr.msk.f32.gmra.mrb[50].mxu0 %vm432_vm2, %v341_v36 }
 0x1f7   : > { %750 = vmatprep.mubr.f32.mxu0 %v3865_v0 }
 0x1f9   : > { %v342_v37 = vpop.trf.xlu0 }
 0x1fa   : > { %1516 = vrot.lane.b32.xlu1 %v342_v37, %s3866_s6  ;;  %3020 = vmatmul.mubr.msk.f32.gmra.mrb[52].mxu0 %vm432_vm2, %v342_v37  ;;  %v2244_v37 = vrot.slane %v429_v34, 4 }
 0x1fb   : > { %756 = vmatprep.mubr.f32.mxu0 %v3865_v0 }
 0x1fc   : > { %2247 = vmatprep.subr.mxu1 %v2244_v37 }
 0x1fd   : > { %v343_v38 = vpop.trf.xlu0 }
 0x1fe   : > { %1518 = vrot.lane.b32.xlu1 %v343_v38, %s3866_s6  ;;  %3021 = vmatmul.mubr.msk.f32.gmra.mrb[54].mxu0 %vm432_vm2, %v343_v38 }
 0x1ff   : > { %762 = vmatprep.mubr.f32.mxu0 %v3865_v0 }
 0x201   : > { %v344_v39 = vpop.trf.xlu0 }
 0x202   : > { %1520 = vrot.lane.b32.xlu1 %v344_v39, %s3866_s6  ;;  %3022 = vmatmul.mubr.msk.f32.gmra.mrb[56].mxu0 %vm432_vm2, %v344_v39 }
 0x203   : > { %768 = vmatprep.mubr.f32.mxu0 %v3865_v0 }
 0x205   : > { %v345_v40 = vpop.trf.xlu0 }
 0x206   : > { %1522 = vrot.lane.b32.xlu1 %v345_v40, %s3866_s6  ;;  %3023 = vmatmul.mubr.msk.f32.gmra.mrb[58].mxu0 %vm432_vm2, %v345_v40 }
 0x207   : > { %774 = vmatprep.mubr.f32.mxu0 %v3865_v0 }
 0x208   : > { %v1467_v41 = vpop.permute.xlu1 %1466 }
 0x209   : > { %v346_v42 = vpop.trf.xlu0 }
 0x20a   : > { %1524 = vrot.lane.b32.xlu1 %v346_v42, %s3866_s6  ;;  %3024 = vmatmul.mubr.msk.f32.gmra.mrb[60].mxu0 %vm432_vm2, %v346_v42 }
 0x20b   : > { %780 = vmatprep.mubr.f32.mxu0 %v3865_v0 }
 0x20c   : > { %v1469_v43 = vpop.permute.xlu1 %1468 }
 0x20d   : > { %v347_v44 = vpop.trf.xlu0 }
 0x20e   : > { %1526 = vrot.lane.b32.xlu1 %v347_v44, %s3866_s6  ;;  %3025 = vmatmul.mubr.msk.f32.gmra.mrb[62].mxu0 %vm432_vm2, %v347_v44 }
 0x20f   : > { %786 = vmatprep.mubr.f32.mxu0 %v3865_v0 }
 0x210   : > { %v1471_v45 = vpop.permute.xlu1 %1470 }
 0x211   : > { %v348_v46 = vpop.trf.xlu0 }
 0x212   : > { %1528 = vrot.lane.b32.xlu1 %v348_v46, %s3866_s6  ;;  %3026 = vmatmul.mubr.msk.f32.gmra.mrb[64].mxu0 %vm432_vm2, %v348_v46 }
 0x213   : > { %1664 = vmatprep.mubr.f32.mxu0 %v3865_v0 }
 0x214   : > { %v1473_v47 = vpop.permute.xlu1 %1472 }
 0x216   : > { %3029 = vmatmul.mubr.msk.f32.vlgmr.msra.gmra.mrb[66].mxu0 %vm432_vm2, %v1467_v41 }
 0x217   : > { %1670 = vmatprep.mubr.f32.mxu0 %v3865_v0 }
 0x218   : > { %v1475_v48 = vpop.permute.xlu1 %1474 }
 0x21a   : > { %3030 = vmatmul.mubr.msk.f32.gmra.mrb[68].mxu0 %vm432_vm2, %v1469_v43 }
 0x21b   : > { %1676 = vmatprep.mubr.f32.mxu0 %v3865_v0 }
 0x21c   : > { %v1477_v49 = vpop.permute.xlu1 %1476 }
 0x21e   : > { %3031 = vmatmul.mubr.msk.f32.gmra.mrb[70].mxu0 %vm432_vm2, %v1471_v45 }
 0x21f   : > { %1682 = vmatprep.mubr.f32.mxu0 %v3865_v0 }
 0x220   : > { %v1479_v50 = vpop.permute.xlu1 %1478 }
 0x222   : > { %3032 = vmatmul.mubr.msk.f32.gmra.mrb[72].mxu0 %vm432_vm2, %v1473_v47 }
 0x223   : > { %1688 = vmatprep.mubr.f32.mxu0 %v3865_v0 }
 0x224   : > { %v1481_v51 = vpop.permute.xlu1 %1480 }
 0x226   : > { %3033 = vmatmul.mubr.msk.f32.gmra.mrb[74].mxu0 %vm432_vm2, %v1475_v48 }
 0x227   : > { %1694 = vmatprep.mubr.f32.mxu0 %v3865_v0 }
 0x228   : > { %v1483_v52 = vpop.permute.xlu1 %1482 }
 0x22a   : > { %3034 = vmatmul.mubr.msk.f32.gmra.mrb[76].mxu0 %vm432_vm2, %v1477_v49 }
 0x22b   : > { %1700 = vmatprep.mubr.f32.mxu0 %v3865_v0 }
 0x22c   : > { %v1485_v53 = vpop.permute.xlu1 %1484 }
 0x22e   : > { %3035 = vmatmul.mubr.msk.f32.gmra.mrb[78].mxu0 %vm432_vm2, %v1479_v50 }
 0x22f   : > { %1706 = vmatprep.mubr.f32.mxu0 %v3865_v0 }
 0x230   : > { %v1487_v54 = vpop.permute.xlu1 %1486 }
 0x232   : > { %3036 = vmatmul.mubr.msk.f32.gmra.mrb[80].mxu0 %vm432_vm2, %v1481_v51 }
 0x233   : > { %1712 = vmatprep.mubr.f32.mxu0 %v3865_v0 }
 0x234   : > { %v1489_v55 = vpop.permute.xlu1 %1488 }
 0x236   : > { %3037 = vmatmul.mubr.msk.f32.gmra.mrb[82].mxu0 %vm432_vm2, %v1483_v52 }
 0x237   : > { %1718 = vmatprep.mubr.f32.mxu0 %v3865_v0 }
 0x238   : > { %v1491_v56 = vpop.permute.xlu1 %1490 }
 0x23a   : > { %3038 = vmatmul.mubr.msk.f32.gmra.mrb[84].mxu0 %vm432_vm2, %v1485_v53 }
 0x23b   : > { %1724 = vmatprep.mubr.f32.mxu0 %v3865_v0 }
 0x23c   : > { %v1493_v57 = vpop.permute.xlu1 %1492 }
 0x23e   : > { %3039 = vmatmul.mubr.msk.f32.gmra.mrb[86].mxu0 %vm432_vm2, %v1487_v54 }
 0x23f   : > { %1730 = vmatprep.mubr.f32.mxu0 %v3865_v0 }
 0x240   : > { %v1495_v58 = vpop.permute.xlu1 %1494 }
 0x242   : > { %3040 = vmatmul.mubr.msk.f32.gmra.mrb[88].mxu0 %vm432_vm2, %v1489_v55 }
 0x243   : > { %1736 = vmatprep.mubr.f32.mxu0 %v3865_v0 }
 0x244   : > { %v1497_v59 = vpop.permute.xlu1 %1496 }
 0x246   : > { %3041 = vmatmul.mubr.msk.f32.gmra.mrb[90].mxu0 %vm432_vm2, %v1491_v56 }
 0x247   : > { %1742 = vmatprep.mubr.f32.mxu0 %v3865_v0 }
 0x248   : > { %v1499_v60 = vpop.permute.xlu1 %1498 }
 0x24a   : > { %3042 = vmatmul.mubr.msk.f32.gmra.mrb[92].mxu0 %vm432_vm2, %v1493_v57 }
 0x24b   : > { %1748 = vmatprep.mubr.f32.mxu0 %v3865_v0 }
 0x24c   : > { %v1501_v1 = vpop.permute.xlu0 %1500 }
 0x24e   : > { %3043 = vmatmul.mubr.msk.f32.gmra.mrb[94].mxu0 %vm432_vm2, %v1495_v58 }
 0x24f   : > { %1754 = vmatprep.mubr.f32.mxu0 %v3865_v0 }
 0x250   : > { %v1503_v61 = vpop.permute.xlu1 %1502 }
 0x252   : > { %3044 = vmatmul.mubr.msk.f32.gmra.mrb[96].mxu0 %vm432_vm2, %v1497_v59 }
 0x253   : > { %1760 = vmatprep.mubr.f32.mxu0 %v3865_v0 }
 0x254   : > { %v1505_v62 = vpop.permute.xlu1 %1504 }
 0x256   : > { %3045 = vmatmul.mubr.msk.f32.gmra.mrb[98].mxu0 %vm432_vm2, %v1499_v60 }
 0x257   : > { %1766 = vmatprep.mubr.f32.mxu0 %v3865_v0 }
 0x258   : > { %v1507_v63 = vpop.permute.xlu1 %1506 }
 0x25a   : > { %3046 = vmatmul.mubr.msk.f32.gmra.mrb[100].mxu0 %vm432_vm2, %v1501_v1 }
 0x25b   : > { %1772 = vmatprep.mubr.f32.mxu0 %v3865_v0 }
 0x25c   : > { %v1509_v2 = vpop.permute.xlu1 %1508 }
 0x25e   : > { %3047 = vmatmul.mubr.msk.f32.gmra.mrb[102].mxu0 %vm432_vm2, %v1503_v61 }
 0x25f   : > { %1778 = vmatprep.mubr.f32.mxu0 %v3865_v0 }
 0x260   : > { %v1511_v3 = vpop.permute.xlu1 %1510 }
 0x262   : > { %3048 = vmatmul.mubr.msk.f32.gmra.mrb[104].mxu0 %vm432_vm2, %v1505_v62 }
 0x263   : > { %1784 = vmatprep.mubr.f32.mxu0 %v3865_v0 }
 0x264   : > { %v1513_v4 = vpop.permute.xlu1 %1512 }
 0x266   : > { %3049 = vmatmul.mubr.msk.f32.gmra.mrb[106].mxu0 %vm432_vm2, %v1507_v63 }
 0x267   : > { %1790 = vmatprep.mubr.f32.mxu0 %v3865_v0 }
 0x268   : > { %v1515_v5 = vpop.permute.xlu1 %1514 }
 0x269   : > { %v4144_v6 = vpop.f32.mrb[2].mxu0 }
 0x26a   : > { %v4146_v7 = vpop.f32.mrb[3].mxu0  ;;  %3050 = vmatmul.mubr.msk.f32.gmra.mrb[108].mxu0 %vm432_vm2, %v1509_v2 }
 0x26b   : > { %1796 = vmatprep.mubr.f32.mxu0 %v3865_v0  ;;  %v793_v8 = vmax.f32 %v4144_v6, %v4146_v7 }
 0x26c   : > { %v1517_v9 = vpop.permute.xlu1 %1516 }
 0x26d   : > { %794 = vmax.xlane.f32.xlu1 %v793_v8  ;;  %v4152_v10 = vpop.f32.mrb[4].mxu0 }
 0x26e   : > { %v4154_v11 = vpop.f32.mrb[5].mxu0  ;;  %3051 = vmatmul.mubr.msk.f32.gmra.mrb[110].mxu0 %vm432_vm2, %v1511_v3 }
 0x26f   : > { %1802 = vmatprep.mubr.f32.mxu0 %v3865_v0  ;;  %v796_v12 = vmax.f32 %v4152_v10, %v4154_v11 }
 0x270   : > { %v1519_v14 = vpop.permute.xlu1 %1518 }
 0x271   : > { %797 = vmax.xlane.f32.xlu1 %v796_v12  ;;  %v4160_v13 = vpop.f32.mrb[6].mxu0 }
 0x272   : > { %v4162_v15 = vpop.f32.mrb[7].mxu0  ;;  %3052 = vmatmul.mubr.msk.f32.gmra.mrb[112].mxu0 %vm432_vm2, %v1513_v4 }
 0x273   : > { %1808 = vmatprep.mubr.f32.mxu0 %v3865_v0  ;;  %v799_v16 = vmax.f32 %v4160_v13, %v4162_v15 }
 0x274   : > { %v1521_v20 = vpop.permute.xlu1 %1520 }
 0x275   : > { %800 = vmax.xlane.f32.xlu1 %v799_v16  ;;  %v4168_v17 = vpop.f32.mrb[8].mxu0 }
 0x276   : > { %v4170_v18 = vpop.f32.mrb[9].mxu0  ;;  %3053 = vmatmul.mubr.msk.f32.gmra.mrb[114].mxu0 %vm432_vm2, %v1515_v5 }
 0x277   : > { %1814 = vmatprep.mubr.f32.mxu0 %v3865_v0  ;;  %v802_v19 = vmax.f32 %v4168_v17, %v4170_v18 }
 0x278   : > { %v1523_v25 = vpop.permute.xlu1 %1522 }
 0x279   : > { %803 = vmax.xlane.f32.xlu0 %v802_v19  ;;  %v4176_v21 = vpop.f32.mrb[10].mxu0 }
 0x27a   : > { %v4178_v22 = vpop.f32.mrb[11].mxu0  ;;  %3054 = vmatmul.mubr.msk.f32.gmra.mrb[116].mxu0 %vm432_vm2, %v1517_v9 }
 0x27b   : > { %1820 = vmatprep.mubr.f32.mxu0 %v3865_v0  ;;  %v805_v23 = vmax.f32 %v4176_v21, %v4178_v22 }
 0x27c   : > { %v1525_v31 = vpop.permute.xlu1 %1524 }
 0x27d   : > { %806 = vmax.xlane.f32.xlu1 %v805_v23  ;;  %v4184_v24 = vpop.f32.mrb[12].mxu0 }
 0x27e   : > { %v4186_v26 = vpop.f32.mrb[13].mxu0  ;;  %3055 = vmatmul.mubr.msk.f32.gmra.mrb[118].mxu0 %vm432_vm2, %v1519_v14 }
 0x27f   : > { %1826 = vmatprep.mubr.f32.mxu0 %v3865_v0  ;;  %v808_v27 = vmax.f32 %v4184_v24, %v4186_v26 }
 0x280   : > { %v1527_v40 = vpop.permute.xlu1 %1526 }
 0x281   : > { %809 = vmax.xlane.f32.xlu1 %v808_v27  ;;  %v4192_v28 = vpop.f32.mrb[14].mxu0 }
 0x282   : > { %v4194_v29 = vpop.f32.mrb[15].mxu0  ;;  %3056 = vmatmul.mubr.msk.f32.gmra.mrb[120].mxu0 %vm432_vm2, %v1521_v20 }
 0x283   : > { %1832 = vmatprep.mubr.f32.mxu0 %v3865_v0  ;;  %v811_v30 = vmax.f32 %v4192_v28, %v4194_v29 }
 0x284   : > { %v1529_v45 = vpop.permute.xlu1 %1528 }
 0x285   : > { %812 = vmax.xlane.f32.xlu1 %v811_v30  ;;  %v4202_v33 = vpop.f32.mrb[16].mxu0 }
 0x286   : > { %v4204_v35 = vpop.f32.mrb[17].mxu0  ;;  %3057 = vmatmul.mubr.msk.f32.gmra.mrb[122].mxu0 %vm432_vm2, %v1523_v25 }
 0x287   : > { %1838 = vmatprep.mubr.f32.mxu0 %v3865_v0  ;;  %v814_v36 = vmax.f32 %v4202_v33, %v4204_v35 }
 0x289   : > { %815 = vmax.xlane.f32.xlu1 %v814_v36  ;;  %v4211_v38 = vpop.f32.mrb[18].mxu0 }
 0x28a   : > { %v4213_v39 = vpop.f32.mrb[19].mxu0  ;;  %3058 = vmatmul.mubr.msk.f32.gmra.mrb[124].mxu0 %vm432_vm2, %v1525_v31 }
 0x28b   : > { %1844 = vmatprep.mubr.f32.mxu0 %v3865_v0  ;;  %v817_v41 = vmax.f32 %v4211_v38, %v4213_v39 }
 0x28d   : > { %818 = vmax.xlane.f32.xlu1 %v817_v41  ;;  %v4219_v42 = vpop.f32.mrb[20].mxu0 }
 0x28e   : > { %v4221_v43 = vpop.f32.mrb[21].mxu0  ;;  %3059 = vmatmul.mubr.msk.f32.gmra.mrb[126].mxu0 %vm432_vm2, %v1527_v40 }
 0x28f   : > { %1850 = vmatprep.mubr.f32.mxu0 %v3865_v0  ;;  %v820_v44 = vmax.f32 %v4219_v42, %v4221_v43 }
 0x291   : > { %821 = vmax.xlane.f32.xlu1 %v820_v44  ;;  %v4227_v46 = vpop.f32.mrb[22].mxu0 }
 0x292   : > { %v4229_v47 = vpop.f32.mrb[23].mxu0  ;;  %3060 = vmatmul.mubr.msk.f32.gmra.mrb[128].mxu0 %vm432_vm2, %v1529_v45 }
 0x293   : > { %v823_v48 = vmax.f32 %v4227_v46, %v4229_v47 }
 0x295   : > { %824 = vmax.xlane.f32.xlu1 %v823_v48  ;;  %v4234_v49 = vpop.f32.mrb[24].mxu0 }
 0x296   : > { %v4236_v50 = vpop.f32.mrb[25].mxu0 }
 0x297   : > { %v826_v0 = vmax.f32 %v4234_v49, %v4236_v50 }
 0x299   : > { %827 = vmax.xlane.f32.xlu1 %v826_v0  ;;  %v4240_v51 = vpop.f32.mrb[26].mxu0 }
 0x29a   : > { %v4242_v52 = vpop.f32.mrb[27].mxu0 }
 0x29b   : > { %v829_v53 = vmax.f32 %v4240_v51, %v4242_v52 }
 0x29d   : > { %830 = vmax.xlane.f32.xlu0 %v829_v53  ;;  %v4246_v54 = vpop.f32.mrb[28].mxu0 }
 0x29e   : > { %v4248_v55 = vpop.f32.mrb[29].mxu0 }
 0x29f   : > { %v832_v56 = vmax.f32 %v4246_v54, %v4248_v55 }
 0x2a1   : > { %833 = vmax.xlane.f32.xlu1 %v832_v56  ;;  %v4252_v57 = vpop.f32.mrb[30].mxu0 }
 0x2a2   : > { %v4254_v58 = vpop.f32.mrb[31].mxu0 }
 0x2a3   : > { %v835_v59 = vmax.f32 %v4252_v57, %v4254_v58 }
 0x2a5   : > { %836 = vmax.xlane.f32.xlu0 %v835_v59  ;;  %v4258_v60 = vpop.f32.mrb[32].mxu0 }
 0x2a6   : > { %v4260_v61 = vpop.f32.mrb[33].mxu0 }
 0x2a7   : > { %v838_v62 = vmax.f32 %v4258_v60, %v4260_v61 }
 0x2a9   : > { %839 = vmax.xlane.f32.xlu1 %v838_v62  ;;  %v4264_v63 = vpop.f32.mrb[34].mxu0 }
 0x2aa   : > { %v4266_v1 = vpop.f32.mrb[35].mxu0 }
 0x2ab   : > { %v841_v2 = vmax.f32 %v4264_v63, %v4266_v1 }
 0x2ad   : > { %842 = vmax.xlane.f32.xlu0 %v841_v2  ;;  %v4270_v3 = vpop.f32.mrb[36].mxu0 }
 0x2ae   : > { %v4272_v4 = vpop.f32.mrb[37].mxu0 }
 0x2af   : > { %v844_v5 = vmax.f32 %v4270_v3, %v4272_v4 }
 0x2b1   : > { %845 = vmax.xlane.f32.xlu1 %v844_v5  ;;  %v4276_v8 = vpop.f32.mrb[38].mxu0 }
 0x2b2   : > { %v4278_v9 = vpop.f32.mrb[39].mxu0 }
 0x2b3   : > { %v847_v12 = vmax.f32 %v4276_v8, %v4278_v9 }
 0x2b5   : > { %848 = vmax.xlane.f32.xlu0 %v847_v12  ;;  %v4282_v14 = vpop.f32.mrb[40].mxu0 }
 0x2b6   : > { %v4284_v16 = vpop.f32.mrb[41].mxu0 }
 0x2b7   : > { %v850_v19 = vmax.f32 %v4282_v14, %v4284_v16 }
 0x2b9   : > { %851 = vmax.xlane.f32.xlu1 %v850_v19  ;;  %v4288_v20 = vpop.f32.mrb[42].mxu0 }
 0x2ba   : > { %v4290_v23 = vpop.f32.mrb[43].mxu0 }
 0x2bb   : > { %v853_v25 = vmax.f32 %v4288_v20, %v4290_v23 }
 0x2bd   : > { %854 = vmax.xlane.f32.xlu0 %v853_v25  ;;  %v4294_v27 = vpop.f32.mrb[44].mxu0 }
 0x2be   : > { %v4296_v30 = vpop.f32.mrb[45].mxu0 }
 0x2bf   : > { %v856_v31 = vmax.f32 %v4294_v27, %v4296_v30 }
 0x2c1   : > { %857 = vmax.xlane.f32.xlu1 %v856_v31  ;;  %v4300_v34 = vpop.f32.mrb[46].mxu0 }
 0x2c2   : > { %v4302_v36 = vpop.f32.mrb[47].mxu0 }
 0x2c3   : > { %v859_v37 = vmax.f32 %v4300_v34, %v4302_v36 }
 0x2c5   : > { %860 = vmax.xlane.f32.xlu0 %v859_v37  ;;  %v4306_v40 = vpop.f32.mrb[48].mxu0 }
 0x2c6   : > { %v4308_v41 = vpop.f32.mrb[49].mxu0 }
 0x2c7   : > { %v862_v44 = vmax.f32 %v4306_v40, %v4308_v41 }
 0x2c9   : > { %863 = vmax.xlane.f32.xlu1 %v862_v44  ;;  %v4312_v45 = vpop.f32.mrb[50].mxu0 }
 0x2ca   : > { %v4314_v48 = vpop.f32.mrb[51].mxu0 }
 0x2cb   : > { %v865_v0 = vmax.f32 %v4312_v45, %v4314_v48 }
 0x2cd   : > { %866 = vmax.xlane.f32.xlu0 %v865_v0  ;;  %v4318_v53 = vpop.f32.mrb[52].mxu0 }
 0x2ce   : > { %5225 = vst [vmem:[#allocation8_spill] sm:$0xff] %v4318_v53  ;;  %v4320_v56 = vpop.f32.mrb[53].mxu0 }
 0x2cf   : > { %5226 = vst [vmem:[#allocation9_spill] sm:$0xff] %v4320_v56  ;;  %v868_v59 = vmax.f32 %v4318_v53, %v4320_v56 }
 0x2d1   : > { %869 = vmax.xlane.f32.xlu1 %v868_v59  ;;  %v4324_v62 = vpop.f32.mrb[54].mxu0 }
 0x2d2   : > { %5227 = vst [vmem:[#allocation10_spill] sm:$0xff] %v4324_v62  ;;  %v4326_v2 = vpop.f32.mrb[55].mxu0 }
 0x2d3   : > { %5228 = vst [vmem:[#allocation11_spill] sm:$0xff] %v4326_v2  ;;  %v871_v5 = vmax.f32 %v4324_v62, %v4326_v2 }
 0x2d5   : > { %872 = vmax.xlane.f32.xlu0 %v871_v5  ;;  %v4330_v12 = vpop.f32.mrb[56].mxu0 }
 0x2d6   : > { %5229 = vst [vmem:[#allocation12_spill] sm:$0xff] %v4330_v12  ;;  %v4332_v19 = vpop.f32.mrb[57].mxu0 }
 0x2d7   : > { %5230 = vst [vmem:[#allocation13_spill] sm:$0xff] %v4332_v19  ;;  %v874_v25 = vmax.f32 %v4330_v12, %v4332_v19 }
 0x2d9   : > { %875 = vmax.xlane.f32.xlu1 %v874_v25  ;;  %v4336_v31 = vpop.f32.mrb[58].mxu0 }
 0x2da   : > { %5231 = vst [vmem:[#allocation14_spill] sm:$0xff] %v4336_v31  ;;  %v4338_v37 = vpop.f32.mrb[59].mxu0 }
 0x2db   : > { %5232 = vst [vmem:[#allocation15_spill] sm:$0xff] %v4338_v37  ;;  %v877_v44 = vmax.f32 %v4336_v31, %v4338_v37 }
 0x2dd   : > { %878 = vmax.xlane.f32.xlu0 %v877_v44  ;;  %v4342_v0 = vpop.f32.mrb[60].mxu0 }
 0x2de   : > { %5233 = vst [vmem:[#allocation16_spill] sm:$0xff] %v4342_v0  ;;  %v4344_v59 = vpop.f32.mrb[61].mxu0 }
 0x2df   : > { %5234 = vst [vmem:[#allocation17_spill] sm:$0xff] %v4344_v59  ;;  %v880_v5 = vmax.f32 %v4342_v0, %v4344_v59 }
 0x2e1   : > { %881 = vmax.xlane.f32.xlu1 %v880_v5  ;;  %v4348_v2 = vpop.f32.mrb[62].mxu0 }
 0x2e2   : > { %5235 = vst [vmem:[#allocation18_spill] sm:$0xff] %v4348_v2  ;;  %v4350_v19 = vpop.f32.mrb[63].mxu0 }
 0x2e3   : > { %5236 = vst [vmem:[#allocation19_spill] sm:$0xff] %v4350_v19  ;;  %v883_v25 = vmax.f32 %v4348_v2, %v4350_v19 }
 0x2e5   : > { %884 = vmax.xlane.f32.xlu0 %v883_v25  ;;  %v4354_v12 = vpop.f32.mrb[64].mxu0 }
 0x2e6   : > { %5237 = vst [vmem:[#allocation20_spill] sm:$0xff] %v4354_v12  ;;  %v4356_v37 = vpop.f32.mrb[65].mxu0 }
 0x2e7   : > { %5238 = vst [vmem:[#allocation21_spill] sm:$0xff] %v4356_v37  ;;  %v886_v44 = vmax.f32 %v4354_v12, %v4356_v37 }
 0x2e9   : > { %v4360_v31 = vpop.f32.mrb[66].mxu0  ;;  %887 = vmax.xlane.f32.xlu1 %v886_v44 }
 0x2ea   : > { %5239 = vst [vmem:[#allocation22_spill] sm:$0xff] %v4360_v31  ;;  %v4362_v59 = vpop.f32.mrb[67].mxu0 }
 0x2eb   : > { %5240 = vst [vmem:[#allocation23_spill] sm:$0xff] %v4362_v59  ;;  %v1857_v5 = vmax.f32 %v4360_v31, %v4362_v59 }
 0x2ed   : > { %1858 = vmax.xlane.f32.xlu0 %v1857_v5  ;;  %v4366_v0 = vpop.f32.mrb[68].mxu0 }
 0x2ee   : > { %5241 = vst [vmem:[#allocation24_spill] sm:$0xff] %v4366_v0  ;;  %v4368_v19 = vpop.f32.mrb[69].mxu0 }
 0x2ef   : > { %5242 = vst [vmem:[#allocation25_spill] sm:$0xff] %v4368_v19  ;;  %v1860_v25 = vmax.f32 %v4366_v0, %v4368_v19 }
 0x2f1   : > { %v4372_v2 = vpop.f32.mrb[70].mxu0  ;;  %1861 = vmax.xlane.f32.xlu1 %v1860_v25 }
 0x2f2   : > { %5243 = vst [vmem:[#allocation26_spill] sm:$0xff] %v4372_v2  ;;  %v4374_v37 = vpop.f32.mrb[71].mxu0 }
 0x2f3   : > { %5244 = vst [vmem:[#allocation27_spill] sm:$0xff] %v4374_v37  ;;  %v1863_v44 = vmax.f32 %v4372_v2, %v4374_v37 }
 0x2f5   : > { %1864 = vmax.xlane.f32.xlu0 %v1863_v44  ;;  %v4378_v12 = vpop.f32.mrb[72].mxu0 }
 0x2f6   : > { %5245 = vst [vmem:[#allocation28_spill] sm:$0xff] %v4378_v12  ;;  %v4380_v59 = vpop.f32.mrb[73].mxu0 }
 0x2f7   : > { %5246 = vst [vmem:[#allocation29_spill] sm:$0xff] %v4380_v59  ;;  %v1866_v5 = vmax.f32 %v4378_v12, %v4380_v59 }
 0x2f9   : > { %v4384_v31 = vpop.f32.mrb[74].mxu0  ;;  %1867 = vmax.xlane.f32.xlu1 %v1866_v5 }
 0x2fa   : > { %v795_v19 = vpop.xlane.xlu1 %794  ;;  %v4386_v0 = vpop.f32.mrb[75].mxu0 }
 0x2fb   : > { %5247 = vst [vmem:[#allocation30_spill] sm:$0xff] %v4386_v0  ;;  %v889_v25 = vsub.f32 %v4144_v6, %v795_v19  ;;  %v890_v62 = vsub.f32 %v4146_v7, %v795_v19  ;;  %v1869_v44 = vmax.f32 %v4384_v31, %v4386_v0 }
 0x2fd   : > { %v953_v37 = vmul.f32 1.442695, %v889_v25  ;;  %v955_v2 = vmul.f32 1.442695, %v890_v62  ;;  %1870 = vmax.xlane.f32.xlu0 %v1869_v44  ;;  %v4392_v56 = vpop.f32.mrb[76].mxu0 }
 0x2fe   : > { %v798_v53 = vpop.xlane.xlu1 %797  ;;  %v4394_v59 = vpop.f32.mrb[77].mxu0 }
 0x2ff   : > { %3368 = vpow2.f32 %v953_v37  ;;  %v891_v5 = vsub.f32 %v4152_v10, %v798_v53  ;;  %v892_v12 = vsub.f32 %v4154_v11, %v798_v53  ;;  %v1872_v6 = vmax.f32 %v4392_v56, %v4394_v59 }
 0x300   : > { %3370 = vpow2.f32 %v955_v2 }
 0x301   : > { %v957_v7 = vmul.f32 1.442695, %v891_v5  ;;  %v959_v19 = vmul.f32 1.442695, %v892_v12  ;;  %v4400_v0 = vpop.f32.mrb[78].mxu0  ;;  %1873 = vmax.xlane.f32.xlu1 %v1872_v6 }
 0x302   : > { %5248 = vst [vmem:[#allocation31_spill] sm:$0xff] %v4400_v0  ;;  %v801_v62 = vpop.xlane.xlu1 %800  ;;  %v4402_v25 = vpop.f32.mrb[79].mxu0 }
 0x303   : > { %5249 = vst [vmem:[#allocation32_spill] sm:$0xff] %v4402_v25  ;;  %3372 = vpow2.f32 %v957_v7  ;;  %v893_v44 = vsub.f32 %v4160_v13, %v801_v62  ;;  %v894_v37 = vsub.f32 %v4162_v15, %v801_v62  ;;  %v1875_v10 = vmax.f32 %v4400_v0, %v4402_v25 }
 0x304   : > { %3374 = vpow2.f32 %v959_v19 }
 0x305   : > { %v961_v11 = vmul.f32 1.442695, %v893_v44  ;;  %v963_v53 = vmul.f32 1.442695, %v894_v37  ;;  %1876 = vmax.xlane.f32.xlu0 %v1875_v10  ;;  %v4408_v2 = vpop.f32.mrb[80].mxu0  ;;  %v2243_v10 = vrot.slane %v4200_v32, 4 }
 0x306   : > { %v804_v12 = vpop.xlane.xlu0 %803  ;;  %v4410_v5 = vpop.f32.mrb[81].mxu0 }
 0x307   : > { %5250 = vst [vmem:[#allocation33_spill] sm:$0xff] %v4410_v5  ;;  %3376 = vpow2.f32 %v961_v11  ;;  %v895_v6 = vsub.f32 %v4168_v17, %v804_v12  ;;  %v896_v7 = vsub.f32 %v4170_v18, %v804_v12  ;;  %v1878_v13 = vmax.f32 %v4408_v2, %v4410_v5 }
 0x308   : > { %3378 = vpow2.f32 %v963_v53 }
 0x309   : > { %v3369_v15 = vpop.eup %3368  ;;  %v965_v62 = vmul.f32 1.442695, %v895_v6  ;;  %v967_v19 = vmul.f32 1.442695, %v896_v7  ;;  %v4416_v44 = vpop.f32.mrb[82].mxu0  ;;  %1879 = vmax.xlane.f32.xlu1 %v1878_v13 }
 0x30a   : > { %v3371_v37 = vpop.eup %3370  ;;  %v807_v25 = vpop.xlane.xlu1 %806 }
 0x30b   : > { %v4419_v0 = vpop.f32.mrb[83].mxu0  ;;  %3380 = vpow2.f32 %v965_v62  ;;  %1241 = vmatprep.mubr.f32.mxu1 %v3371_v37  ;;  %v897_v17 = vsub.f32 %v4176_v21, %v807_v25  ;;  %v898_v18 = vsub.f32 %v4178_v22, %v807_v25  ;;  %v4425_v53 = vadd.f32 %v3371_v37, %v3369_v15 }
 0x30c   : > { %v1881_v11 = vmax.f32 %v4416_v44, %v4419_v0  ;;  %3382 = vpow2.f32 %v967_v19  ;;  %1242 = vmatmul.mubr.f32.vlgmr.msra.gmra.mrb[4].mxu1 %v3369_v15 }
 0x30d   : > { %v3373_v12 = vpop.eup %3372  ;;  %v969_v6 = vmul.f32 1.442695, %v897_v17  ;;  %v971_v7 = vmul.f32 1.442695, %v898_v18  ;;  %2248 = vmatpush1.xpose.msra.mxu1 %v2243_v10  ;;  %v4427_v32 = vpop.f32.mrb[84].mxu0 }
 0x30e   : > { %1882 = vmax.xlane.f32.xlu0 %v1881_v11  ;;  %v3375_v13 = vpop.eup %3374  ;;  %v810_v62 = vpop.xlane.xlu1 %809 }
 0x30f   : > { %v4429_v5 = vpop.f32.mrb[85].mxu0  ;;  %3384 = vpow2.f32 %v969_v6  ;;  %v899_v21 = vsub.f32 %v4184_v24, %v810_v62  ;;  %v900_v22 = vsub.f32 %v4186_v26, %v810_v62  ;;  %1246 = vmatprep.mubr.f32.mxu1 %v3375_v13  ;;  %v4435_v15 = vadd.f32 %v3375_v13, %v3373_v12 }
 0x310   : > { %5251 = vst [vmem:[#allocation34_spill] sm:$0xff] %v4429_v5  ;;  %v1884_v25 = vmax.f32 %v4427_v32, %v4429_v5  ;;  %3386 = vpow2.f32 %v971_v7  ;;  %1247 = vmatmul.mubr.f32.gmra.mrb[6].mxu1 %v3373_v12 }
 0x311   : > { %v3377_v19 = vpop.eup %3376  ;;  %v973_v37 = vmul.f32 1.442695, %v899_v21  ;;  %v975_v10 = vmul.f32 1.442695, %v900_v22  ;;  %v4437_v17 = vpop.f32.mrb[86].mxu0 }
 0x312   : > { %1885 = vmax.xlane.f32.xlu1 %v1884_v25  ;;  %v3379_v18 = vpop.eup %3378  ;;  %v813_v11 = vpop.xlane.xlu1 %812 }
 0x313   : > { %v4439_v6 = vpop.f32.mrb[87].mxu0  ;;  %3388 = vpow2.f32 %v973_v37  ;;  %v901_v24 = vsub.f32 %v4192_v28, %v813_v11  ;;  %v902_v26 = vsub.f32 %v4194_v29, %v813_v11  ;;  %1251 = vmatprep.mubr.f32.mxu1 %v3379_v18  ;;  %v4445_v7 = vadd.f32 %v3379_v18, %v3377_v19 }
 0x314   : > { %5252 = vst [vmem:[#allocation35_spill] sm:$0xff] %v4439_v6  ;;  %v1887_v12 = vmax.f32 %v4437_v17, %v4439_v6  ;;  %3390 = vpow2.f32 %v975_v10  ;;  %1252 = vmatmul.mubr.f32.gmra.mrb[8].mxu1 %v3377_v19 }
 0x315   : > { %v3381_v13 = vpop.eup %3380  ;;  %v977_v62 = vmul.f32 1.442695, %v901_v24  ;;  %v979_v21 = vmul.f32 1.442695, %v902_v26  ;;  %v4447_v22 = vpop.f32.mrb[88].mxu0 }
 0x316   : > { %1888 = vmax.xlane.f32.xlu0 %v1887_v12  ;;  %v3383_v25 = vpop.eup %3382  ;;  %v816_v37 = vpop.xlane.xlu1 %815 }
 0x317   : > { %v4449_v5 = vpop.f32.mrb[89].mxu0  ;;  %3392 = vpow2.f32 %v977_v62  ;;  %v903_v28 = vsub.f32 %v4202_v33, %v816_v37  ;;  %v904_v29 = vsub.f32 %v4204_v35, %v816_v37  ;;  %1256 = vmatprep.mubr.f32.mxu1 %v3383_v25  ;;  %v4455_v10 = vadd.f32 %v3383_v25, %v3381_v13 }
 0x318   : > { %5253 = vst [vmem:[#allocation36_spill] sm:$0xff] %v4449_v5  ;;  %v1890_v19 = vmax.f32 %v4447_v22, %v4449_v5  ;;  %3394 = vpow2.f32 %v979_v21  ;;  %1257 = vmatmul.mubr.f32.gmra.mrb[10].mxu1 %v3381_v13 }
 0x319   : > { %v3385_v18 = vpop.eup %3384  ;;  %v981_v11 = vmul.f32 1.442695, %v903_v28  ;;  %v983_v24 = vmul.f32 1.442695, %v904_v29  ;;  %v4457_v26 = vpop.f32.mrb[90].mxu0 }
 0x31a   : > { %1891 = vmax.xlane.f32.xlu1 %v1890_v19  ;;  %v3387_v12 = vpop.eup %3386  ;;  %v819_v62 = vpop.xlane.xlu1 %818 }
 0x31b   : > { %v4459_v6 = vpop.f32.mrb[91].mxu0  ;;  %3396 = vpow2.f32 %v981_v11  ;;  %v905_v33 = vsub.f32 %v4211_v38, %v819_v62  ;;  %v906_v35 = vsub.f32 %v4213_v39, %v819_v62  ;;  %1261 = vmatprep.mubr.f32.mxu1 %v3387_v12  ;;  %v4465_v21 = vadd.f32 %v3387_v12, %v3385_v18 }
 0x31c   : > { %5254 = vst [vmem:[#allocation37_spill] sm:$0xff] %v4459_v6  ;;  %v1893_v13 = vmax.f32 %v4457_v26, %v4459_v6  ;;  %3398 = vpow2.f32 %v983_v24  ;;  %1262 = vmatmul.mubr.f32.gmra.mrb[12].mxu1 %v3385_v18 }
 0x31d   : > { %v3389_v25 = vpop.eup %3388  ;;  %v985_v37 = vmul.f32 1.442695, %v905_v33  ;;  %v987_v28 = vmul.f32 1.442695, %v906_v35  ;;  %v4467_v29 = vpop.f32.mrb[92].mxu0 }
 0x31e   : > { %1894 = vmax.xlane.f32.xlu0 %v1893_v13  ;;  %v3391_v19 = vpop.eup %3390  ;;  %v822_v11 = vpop.xlane.xlu1 %821 }
 0x31f   : > { %v4469_v5 = vpop.f32.mrb[93].mxu0  ;;  %3400 = vpow2.f32 %v985_v37  ;;  %v907_v38 = vsub.f32 %v4219_v42, %v822_v11  ;;  %v908_v39 = vsub.f32 %v4221_v43, %v822_v11  ;;  %1266 = vmatprep.mubr.f32.mxu1 %v3391_v19  ;;  %v4475_v24 = vadd.f32 %v3391_v19, %v3389_v25 }
 0x320   : > { %5255 = vst [vmem:[#allocation38_spill] sm:$0xff] %v4469_v5  ;;  %v1896_v18 = vmax.f32 %v4467_v29, %v4469_v5  ;;  %3402 = vpow2.f32 %v987_v28  ;;  %1267 = vmatmul.mubr.f32.gmra.mrb[14].mxu1 %v3389_v25 }
 0x321   : > { %v3393_v12 = vpop.eup %3392  ;;  %v989_v62 = vmul.f32 1.442695, %v907_v38  ;;  %v991_v33 = vmul.f32 1.442695, %v908_v39  ;;  %v4477_v35 = vpop.f32.mrb[94].mxu0 }
 0x322   : > { %1897 = vmax.xlane.f32.xlu1 %v1896_v18  ;;  %v3395_v13 = vpop.eup %3394  ;;  %v825_v37 = vpop.xlane.xlu1 %824 }
 0x323   : > { %v4479_v6 = vpop.f32.mrb[95].mxu0  ;;  %3404 = vpow2.f32 %v989_v62  ;;  %v909_v42 = vsub.f32 %v4227_v46, %v825_v37  ;;  %v910_v43 = vsub.f32 %v4229_v47, %v825_v37  ;;  %1271 = vmatprep.mubr.f32.mxu1 %v3395_v13  ;;  %v4485_v28 = vadd.f32 %v3395_v13, %v3393_v12 }
 0x324   : > { %5256 = vst [vmem:[#allocation39_spill] sm:$0xff] %v4479_v6  ;;  %v1899_v25 = vmax.f32 %v4477_v35, %v4479_v6  ;;  %3406 = vpow2.f32 %v991_v33  ;;  %1272 = vmatmul.mubr.f32.gmra.mrb[16].mxu1 %v3393_v12 }
 0x325   : > { %v3397_v19 = vpop.eup %3396  ;;  %v993_v11 = vmul.f32 1.442695, %v909_v42  ;;  %v995_v38 = vmul.f32 1.442695, %v910_v43  ;;  %v4487_v39 = vpop.f32.mrb[96].mxu0 }
 0x326   : > { %1900 = vmax.xlane.f32.xlu0 %v1899_v25  ;;  %v3399_v18 = vpop.eup %3398  ;;  %v828_v62 = vpop.xlane.xlu1 %827 }
 0x327   : > { %v4489_v5 = vpop.f32.mrb[97].mxu0  ;;  %3408 = vpow2.f32 %v993_v11  ;;  %v911_v46 = vsub.f32 %v4234_v49, %v828_v62  ;;  %v912_v47 = vsub.f32 %v4236_v50, %v828_v62  ;;  %1276 = vmatprep.mubr.f32.mxu1 %v3399_v18  ;;  %v4495_v33 = vadd.f32 %v3399_v18, %v3397_v19 }
 0x328   : > { %5257 = vst [vmem:[#allocation40_spill] sm:$0xff] %v4489_v5  ;;  %v1902_v12 = vmax.f32 %v4487_v39, %v4489_v5  ;;  %3410 = vpow2.f32 %v995_v38  ;;  %1277 = vmatmul.mubr.f32.gmra.mrb[18].mxu1 %v3397_v19 }
 0x329   : > { %v3401_v13 = vpop.eup %3400  ;;  %v997_v37 = vmul.f32 1.442695, %v911_v46  ;;  %v999_v42 = vmul.f32 1.442695, %v912_v47  ;;  %v4497_v43 = vpop.f32.mrb[98].mxu0 }
 0x32a   : > { %1903 = vmax.xlane.f32.xlu1 %v1902_v12  ;;  %v3403_v25 = vpop.eup %3402  ;;  %v831_v11 = vpop.xlane.xlu0 %830 }
 0x32b   : > { %v4499_v6 = vpop.f32.mrb[99].mxu0  ;;  %3412 = vpow2.f32 %v997_v37  ;;  %v913_v49 = vsub.f32 %v4240_v51, %v831_v11  ;;  %v914_v50 = vsub.f32 %v4242_v52, %v831_v11  ;;  %1281 = vmatprep.mubr.f32.mxu1 %v3403_v25  ;;  %v4505_v38 = vadd.f32 %v3403_v25, %v3401_v13 }
 0x32c   : > { %5258 = vst [vmem:[#allocation41_spill] sm:$0xff] %v4499_v6  ;;  %v1905_v19 = vmax.f32 %v4497_v43, %v4499_v6  ;;  %3414 = vpow2.f32 %v999_v42  ;;  %1282 = vmatmul.mubr.f32.gmra.mrb[20].mxu1 %v3401_v13 }
 0x32d   : > { %v3405_v18 = vpop.eup %3404  ;;  %v1001_v62 = vmul.f32 1.442695, %v913_v49  ;;  %v1003_v46 = vmul.f32 1.442695, %v914_v50  ;;  %v4507_v47 = vpop.f32.mrb[100].mxu0 }
 0x32e   : > { %1906 = vmax.xlane.f32.xlu0 %v1905_v19  ;;  %v3407_v12 = vpop.eup %3406  ;;  %v834_v37 = vpop.xlane.xlu1 %833 }
 0x32f   : > { %v4509_v5 = vpop.f32.mrb[101].mxu0  ;;  %3416 = vpow2.f32 %v1001_v62  ;;  %v915_v51 = vsub.f32 %v4246_v54, %v834_v37  ;;  %v916_v52 = vsub.f32 %v4248_v55, %v834_v37  ;;  %1286 = vmatprep.mubr.f32.mxu1 %v3407_v12  ;;  %v4515_v42 = vadd.f32 %v3407_v12, %v3405_v18 }
 0x330   : > { %5259 = vst [vmem:[#allocation42_spill] sm:$0xff] %v4509_v5  ;;  %v1908_v13 = vmax.f32 %v4507_v47, %v4509_v5  ;;  %3418 = vpow2.f32 %v1003_v46  ;;  %1287 = vmatmul.mubr.f32.gmra.mrb[22].mxu1 %v3405_v18 }
 0x331   : > { %v3409_v25 = vpop.eup %3408  ;;  %v1005_v11 = vmul.f32 1.442695, %v915_v51  ;;  %v1007_v49 = vmul.f32 1.442695, %v916_v52  ;;  %v4517_v50 = vpop.f32.mrb[102].mxu0 }
 0x332   : > { %1909 = vmax.xlane.f32.xlu1 %v1908_v13  ;;  %v3411_v19 = vpop.eup %3410  ;;  %v837_v62 = vpop.xlane.xlu0 %836 }
 0x333   : > { %v4519_v6 = vpop.f32.mrb[103].mxu0  ;;  %3420 = vpow2.f32 %v1005_v11  ;;  %v917_v54 = vsub.f32 %v4252_v57, %v837_v62  ;;  %v918_v55 = vsub.f32 %v4254_v58, %v837_v62  ;;  %1291 = vmatprep.mubr.f32.mxu1 %v3411_v19  ;;  %v4525_v46 = vadd.f32 %v3411_v19, %v3409_v25 }
 0x334   : > { %v1911_v18 = vmax.f32 %v4517_v50, %v4519_v6  ;;  %3422 = vpow2.f32 %v1007_v49  ;;  %1292 = vmatmul.mubr.f32.gmra.mrb[24].mxu1 %v3409_v25 }
 0x335   : > { %5260 = vst [vmem:[#allocation43_spill] sm:$0xff] %v4525_v46  ;;  %v3413_v12 = vpop.eup %3412  ;;  %v1009_v37 = vmul.f32 1.442695, %v917_v54  ;;  %v1011_v51 = vmul.f32 1.442695, %v918_v55  ;;  %v4527_v52 = vpop.f32.mrb[104].mxu0 }
 0x336   : > { %1912 = vmax.xlane.f32.xlu0 %v1911_v18  ;;  %v3415_v13 = vpop.eup %3414  ;;  %v840_v11 = vpop.xlane.xlu1 %839 }
 0x337   : > { %v4529_v5 = vpop.f32.mrb[105].mxu0  ;;  %3424 = vpow2.f32 %v1009_v37  ;;  %v919_v57 = vsub.f32 %v4258_v60, %v840_v11  ;;  %v920_v58 = vsub.f32 %v4260_v61, %v840_v11  ;;  %1296 = vmatprep.mubr.f32.mxu1 %v3415_v13  ;;  %v4535_v49 = vadd.f32 %v3415_v13, %v3413_v12 }
 0x338   : > { %v1914_v25 = vmax.f32 %v4527_v52, %v4529_v5  ;;  %3426 = vpow2.f32 %v1011_v51  ;;  %1297 = vmatmul.mubr.f32.gmra.mrb[26].mxu1 %v3413_v12 }
 0x339   : > { %5261 = vst [vmem:[#allocation44_spill] sm:$0xff] %v4535_v49  ;;  %v3417_v19 = vpop.eup %3416  ;;  %v1013_v62 = vmul.f32 1.442695, %v919_v57  ;;  %v1015_v54 = vmul.f32 1.442695, %v920_v58  ;;  %v4537_v55 = vpop.f32.mrb[106].mxu0 }
 0x33a   : > { %1915 = vmax.xlane.f32.xlu1 %v1914_v25  ;;  %v3419_v18 = vpop.eup %3418  ;;  %v843_v37 = vpop.xlane.xlu0 %842 }
 0x33b   : > { %v4539_v46 = vpop.f32.mrb[107].mxu0  ;;  %3428 = vpow2.f32 %v1013_v62  ;;  %v921_v60 = vsub.f32 %v4264_v63, %v843_v37  ;;  %v922_v61 = vsub.f32 %v4266_v1, %v843_v37  ;;  %1301 = vmatprep.mubr.f32.mxu1 %v3419_v18  ;;  %v4545_v51 = vadd.f32 %v3419_v18, %v3417_v19 }
 0x33c   : > { %v1917_v12 = vmax.f32 %v4537_v55, %v4539_v46  ;;  %3430 = vpow2.f32 %v1015_v54  ;;  %1302 = vmatmul.mubr.f32.gmra.mrb[28].mxu1 %v3417_v19 }
 0x33d   : > { %5262 = vst [vmem:[#allocation45_spill] sm:$0xff] %v4545_v51  ;;  %v3421_v13 = vpop.eup %3420  ;;  %v1017_v11 = vmul.f32 1.442695, %v921_v60  ;;  %v1019_v57 = vmul.f32 1.442695, %v922_v61  ;;  %v4547_v58 = vpop.f32.mrb[108].mxu0 }
 0x33e   : > { %1918 = vmax.xlane.f32.xlu0 %v1917_v12  ;;  %v3423_v25 = vpop.eup %3422  ;;  %v846_v62 = vpop.xlane.xlu1 %845 }
 0x33f   : > { %v4549_v49 = vpop.f32.mrb[109].mxu0  ;;  %3432 = vpow2.f32 %v1017_v11  ;;  %v923_v63 = vsub.f32 %v4270_v3, %v846_v62  ;;  %v924_v1 = vsub.f32 %v4272_v4, %v846_v62  ;;  %1306 = vmatprep.mubr.f32.mxu1 %v3423_v25  ;;  %v4555_v54 = vadd.f32 %v3423_v25, %v3421_v13 }
 0x340   : > { %v1920_v19 = vmax.f32 %v4547_v58, %v4549_v49  ;;  %3434 = vpow2.f32 %v1019_v57  ;;  %1307 = vmatmul.mubr.f32.gmra.mrb[30].mxu1 %v3421_v13 }
 0x341   : > { %5263 = vst [vmem:[#allocation46_spill] sm:$0xff] %v4555_v54  ;;  %v3425_v18 = vpop.eup %3424  ;;  %v1021_v37 = vmul.f32 1.442695, %v923_v63  ;;  %v1023_v60 = vmul.f32 1.442695, %v924_v1  ;;  %v4557_v61 = vpop.f32.mrb[110].mxu0 }
 0x342   : > { %1921 = vmax.xlane.f32.xlu1 %v1920_v19  ;;  %v3427_v12 = vpop.eup %3426  ;;  %v849_v11 = vpop.xlane.xlu0 %848 }
 0x343   : > { %v4559_v51 = vpop.f32.mrb[111].mxu0  ;;  %3436 = vpow2.f32 %v1021_v37  ;;  %v925_v3 = vsub.f32 %v4276_v8, %v849_v11  ;;  %v926_v4 = vsub.f32 %v4278_v9, %v849_v11  ;;  %1311 = vmatprep.mubr.f32.mxu1 %v3427_v12  ;;  %v4565_v57 = vadd.f32 %v3427_v12, %v3425_v18 }
 0x344   : > { %v1923_v13 = vmax.f32 %v4557_v61, %v4559_v51  ;;  %3438 = vpow2.f32 %v1023_v60  ;;  %1312 = vmatmul.mubr.f32.gmra.mrb[32].mxu1 %v3425_v18 }
 0x345   : > { %5264 = vst [vmem:[#allocation47_spill] sm:$0xff] %v4565_v57  ;;  %v3429_v25 = vpop.eup %3428  ;;  %v1025_v62 = vmul.f32 1.442695, %v925_v3  ;;  %v1027_v63 = vmul.f32 1.442695, %v926_v4  ;;  %v4567_v1 = vpop.f32.mrb[112].mxu0 }
 0x346   : > { %1924 = vmax.xlane.f32.xlu0 %v1923_v13  ;;  %v3431_v19 = vpop.eup %3430  ;;  %v852_v37 = vpop.xlane.xlu1 %851 }
 0x347   : > { %v4569_v54 = vpop.f32.mrb[113].mxu0  ;;  %3440 = vpow2.f32 %v1025_v62  ;;  %v927_v8 = vsub.f32 %v4282_v14, %v852_v37  ;;  %v928_v9 = vsub.f32 %v4284_v16, %v852_v37  ;;  %1316 = vmatprep.mubr.f32.mxu1 %v3431_v19  ;;  %v4575_v60 = vadd.f32 %v3431_v19, %v3429_v25 }
 0x348   : > { %v1926_v18 = vmax.f32 %v4567_v1, %v4569_v54  ;;  %3442 = vpow2.f32 %v1027_v63  ;;  %1317 = vmatmul.mubr.f32.gmra.mrb[34].mxu1 %v3429_v25 }
 0x349   : > { %5265 = vst [vmem:[#allocation48_spill] sm:$0xff] %v4575_v60  ;;  %v3433_v12 = vpop.eup %3432  ;;  %v1029_v11 = vmul.f32 1.442695, %v927_v8  ;;  %v1031_v3 = vmul.f32 1.442695, %v928_v9  ;;  %v4577_v4 = vpop.f32.mrb[114].mxu0 }
 0x34a   : > { %1927 = vmax.xlane.f32.xlu1 %v1926_v18  ;;  %v3435_v13 = vpop.eup %3434  ;;  %v855_v62 = vpop.xlane.xlu0 %854 }
 0x34b   : > { %v4579_v57 = vpop.f32.mrb[115].mxu0  ;;  %3444 = vpow2.f32 %v1029_v11  ;;  %v929_v14 = vsub.f32 %v4288_v20, %v855_v62  ;;  %v930_v16 = vsub.f32 %v4290_v23, %v855_v62  ;;  %1321 = vmatprep.mubr.f32.mxu1 %v3435_v13  ;;  %v4585_v63 = vadd.f32 %v3435_v13, %v3433_v12 }
 0x34c   : > { %5266 = vst [vmem:[#allocation49_spill] sm:$0xff] %v4579_v57  ;;  %v1929_v25 = vmax.f32 %v4577_v4, %v4579_v57  ;;  %3446 = vpow2.f32 %v1031_v3  ;;  %1322 = vmatmul.mubr.f32.gmra.mrb[36].mxu1 %v3433_v12 }
 0x34d   : > { %v3437_v19 = vpop.eup %3436  ;;  %v1033_v37 = vmul.f32 1.442695, %v929_v14  ;;  %v1035_v8 = vmul.f32 1.442695, %v930_v16  ;;  %v4587_v9 = vpop.f32.mrb[116].mxu0 }
 0x34e   : > { %1930 = vmax.xlane.f32.xlu0 %v1929_v25  ;;  %5267 = vst [vmem:[#allocation50_spill] sm:$0xff] %v4587_v9  ;;  %v3439_v18 = vpop.eup %3438  ;;  %v858_v11 = vpop.xlane.xlu1 %857 }
 0x34f   : > { %v4589_v60 = vpop.f32.mrb[117].mxu0  ;;  %3448 = vpow2.f32 %v1033_v37  ;;  %v931_v20 = vsub.f32 %v4294_v27, %v858_v11  ;;  %v932_v23 = vsub.f32 %v4296_v30, %v858_v11  ;;  %1326 = vmatprep.mubr.f32.mxu1 %v3439_v18  ;;  %v4595_v3 = vadd.f32 %v3439_v18, %v3437_v19 }
 0x350   : > { %5268 = vst [vmem:[#allocation51_spill] sm:$0xff] %v4589_v60  ;;  %v1932_v12 = vmax.f32 %v4587_v9, %v4589_v60  ;;  %3450 = vpow2.f32 %v1035_v8  ;;  %1327 = vmatmul.mubr.f32.gmra.mrb[38].mxu1 %v3437_v19 }
 0x351   : > { %v3441_v13 = vpop.eup %3440  ;;  %v1037_v62 = vmul.f32 1.442695, %v931_v20  ;;  %v1039_v14 = vmul.f32 1.442695, %v932_v23  ;;  %v4597_v16 = vpop.f32.mrb[118].mxu0 }
 0x352   : > { %5269 = vst [vmem:[#allocation52_spill] sm:$0xff] %v4597_v16  ;;  %1933 = vmax.xlane.f32.xlu1 %v1932_v12  ;;  %v3443_v25 = vpop.eup %3442  ;;  %v861_v37 = vpop.xlane.xlu0 %860 }
 0x353   : > { %v4599_v57 = vpop.f32.mrb[119].mxu0  ;;  %3452 = vpow2.f32 %v1037_v62  ;;  %v933_v27 = vsub.f32 %v4300_v34, %v861_v37  ;;  %v934_v30 = vsub.f32 %v4302_v36, %v861_v37  ;;  %1331 = vmatprep.mubr.f32.mxu1 %v3443_v25  ;;  %v4605_v8 = vadd.f32 %v3443_v25, %v3441_v13 }
 0x354   : > { %5270 = vst [vmem:[#allocation53_spill] sm:$0xff] %v4599_v57  ;;  %v1935_v19 = vmax.f32 %v4597_v16, %v4599_v57  ;;  %3454 = vpow2.f32 %v1039_v14  ;;  %1332 = vmatmul.mubr.f32.gmra.mrb[40].mxu1 %v3441_v13 }
 0x355   : > { %v3445_v18 = vpop.eup %3444  ;;  %v1041_v11 = vmul.f32 1.442695, %v933_v27  ;;  %v1043_v20 = vmul.f32 1.442695, %v934_v30  ;;  %v4607_v23 = vpop.f32.mrb[120].mxu0 }
 0x356   : > { %1936 = vmax.xlane.f32.xlu0 %v1935_v19  ;;  %5271 = vst [vmem:[#allocation54_spill] sm:$0xff] %v4607_v23  ;;  %v3447_v12 = vpop.eup %3446  ;;  %v864_v62 = vpop.xlane.xlu1 %863 }
 0x357   : > { %v4609_v60 = vpop.f32.mrb[121].mxu0  ;;  %3456 = vpow2.f32 %v1041_v11  ;;  %v935_v34 = vsub.f32 %v4306_v40, %v864_v62  ;;  %v936_v36 = vsub.f32 %v4308_v41, %v864_v62  ;;  %1336 = vmatprep.mubr.f32.mxu1 %v3447_v12  ;;  %v4615_v14 = vadd.f32 %v3447_v12, %v3445_v18 }
 0x358   : > { %5272 = vst [vmem:[#allocation55_spill] sm:$0xff] %v4609_v60  ;;  %v1938_v13 = vmax.f32 %v4607_v23, %v4609_v60  ;;  %3458 = vpow2.f32 %v1043_v20  ;;  %1337 = vmatmul.mubr.f32.gmra.mrb[42].mxu1 %v3445_v18 }
 0x359   : > { %v3449_v25 = vpop.eup %3448  ;;  %v1045_v37 = vmul.f32 1.442695, %v935_v34  ;;  %v1047_v27 = vmul.f32 1.442695, %v936_v36  ;;  %v4617_v30 = vpop.f32.mrb[122].mxu0 }
 0x35a   : > { %5273 = vst [vmem:[#allocation56_spill] sm:$0xff] %v4617_v30  ;;  %1939 = vmax.xlane.f32.xlu1 %v1938_v13  ;;  %v3451_v19 = vpop.eup %3450  ;;  %v867_v11 = vpop.xlane.xlu0 %866 }
 0x35b   : > { %v4619_v57 = vpop.f32.mrb[123].mxu0  ;;  %3460 = vpow2.f32 %v1045_v37  ;;  %v937_v40 = vsub.f32 %v4312_v45, %v867_v11  ;;  %v938_v41 = vsub.f32 %v4314_v48, %v867_v11  ;;  %1341 = vmatprep.mubr.f32.mxu1 %v3451_v19  ;;  %v4625_v20 = vadd.f32 %v3451_v19, %v3449_v25  ;;  %v5277_v45 = vld [vmem:[#allocation8_spill] sm:$0xff]  ;;  %v5278_v11 = vld [vmem:[#allocation9_spill] sm:$0xff] }
 0x35c   : > { %5274 = vst [vmem:[#allocation57_spill] sm:$0xff] %v4619_v57  ;;  %v1941_v18 = vmax.f32 %v4617_v30, %v4619_v57  ;;  %3462 = vpow2.f32 %v1047_v27  ;;  %1342 = vmatmul.mubr.f32.gmra.mrb[44].mxu1 %v3449_v25 }
 0x35d   : > { %v3453_v12 = vpop.eup %3452  ;;  %v1049_v62 = vmul.f32 1.442695, %v937_v40  ;;  %v1051_v34 = vmul.f32 1.442695, %v938_v41  ;;  %v4627_v36 = vpop.f32.mrb[124].mxu0 }
 0x35e   : > { %1942 = vmax.xlane.f32.xlu0 %v1941_v18  ;;  %5275 = vst [vmem:[#allocation58_spill] sm:$0xff] %v4627_v36  ;;  %v3455_v13 = vpop.eup %3454  ;;  %v870_v37 = vpop.xlane.xlu1 %869 }
 0x35f   : > { %v4629_v60 = vpop.f32.mrb[125].mxu0  ;;  %3464 = vpow2.f32 %v1049_v62  ;;  %v939_v48 = vsub.f32 %v5277_v45, %v870_v37  ;;  %v940_v23 = vsub.f32 %v5278_v11, %v870_v37  ;;  %1346 = vmatprep.mubr.f32.mxu1 %v3455_v13  ;;  %v4635_v27 = vadd.f32 %v3455_v13, %v3453_v12  ;;  %v5281_v37 = vld [vmem:[#allocation10_spill] sm:$0xff]  ;;  %v5282_v11 = vld [vmem:[#allocation11_spill] sm:$0xff] }
 0x360   : > { %5276 = vst [vmem:[#allocation59_spill] sm:$0xff] %v4629_v60  ;;  %v1944_v25 = vmax.f32 %v4627_v36, %v4629_v60  ;;  %3466 = vpow2.f32 %v1051_v34  ;;  %1347 = vmatmul.mubr.f32.gmra.mrb[46].mxu1 %v3453_v12 }
 0x361   : > { %v3457_v19 = vpop.eup %3456  ;;  %v1053_v40 = vmul.f32 1.442695, %v939_v48  ;;  %v1055_v41 = vmul.f32 1.442695, %v940_v23  ;;  %v4637_v18 = vpop.f32.mrb[126].mxu0 }
 0x362   : > { %5279 = vst [vmem:[#allocation8_spill] sm:$0xff] %v4637_v18  ;;  %1945 = vmax.xlane.f32.xlu1 %v1944_v25  ;;  %v3459_v57 = vpop.eup %3458  ;;  %v873_v62 = vpop.xlane.xlu0 %872 }
 0x363   : > { %v4639_v30 = vpop.f32.mrb[127].mxu0  ;;  %3468 = vpow2.f32 %v1053_v40  ;;  %v941_v45 = vsub.f32 %v5281_v37, %v873_v62  ;;  %v942_v16 = vsub.f32 %v5282_v11, %v873_v62  ;;  %1351 = vmatprep.mubr.f32.mxu1 %v3459_v57  ;;  %v4645_v34 = vadd.f32 %v3459_v57, %v3457_v19  ;;  %v5283_v62 = vld [vmem:[#allocation12_spill] sm:$0xff]  ;;  %v5284_v11 = vld [vmem:[#allocation13_spill] sm:$0xff] }
 0x364   : > { %5280 = vst [vmem:[#allocation9_spill] sm:$0xff] %v4639_v30  ;;  %v1947_v12 = vmax.f32 %v4637_v18, %v4639_v30  ;;  %3470 = vpow2.f32 %v1055_v41  ;;  %1352 = vmatmul.mubr.f32.gmra.mrb[48].mxu1 %v3457_v19 }
 0x365   : > { %v3461_v23 = vpop.eup %3460  ;;  %v1057_v13 = vmul.f32 1.442695, %v941_v45  ;;  %v1059_v48 = vmul.f32 1.442695, %v942_v16  ;;  %v4647_v25 = vpop.f32.mrb[128].mxu0 }
 0x366   : > { %1948 = vmax.xlane.f32.xlu0 %v1947_v12  ;;  %v3463_v60 = vpop.eup %3462  ;;  %v876_v40 = vpop.xlane.xlu1 %875 }
 0x367   : > { %v4649_v36 = vpop.f32.mrb[129].mxu0  ;;  %3472 = vpow2.f32 %v1057_v13  ;;  %v943_v37 = vsub.f32 %v5283_v62, %v876_v40  ;;  %v944_v9 = vsub.f32 %v5284_v11, %v876_v40  ;;  %1356 = vmatprep.mubr.f32.mxu1 %v3463_v60  ;;  %v4655_v19 = vadd.f32 %v3463_v60, %v3461_v23  ;;  %v5285_v62 = vld [vmem:[#allocation14_spill] sm:$0xff]  ;;  %v5286_v40 = vld [vmem:[#allocation15_spill] sm:$0xff] }
 0x368   : > { %v1950_v57 = vmax.f32 %v4647_v25, %v4649_v36  ;;  %3474 = vpow2.f32 %v1059_v48  ;;  %1357 = vmatmul.mubr.f32.gmra.mrb[50].mxu1 %v3461_v23 }
 0x369   : > { %v3465_v16 = vpop.eup %3464  ;;  %v1061_v41 = vmul.f32 1.442695, %v943_v37  ;;  %v1063_v45 = vmul.f32 1.442695, %v944_v9  ;;  %v5287_v37 = vld [vmem:[#allocation16_spill] sm:$0xff] }
 0x36a   : > { %1130 = vadd.xlane.f32.xlu0 %v4585_v63  ;;  %1951 = vmax.xlane.f32.xlu1 %v1950_v57  ;;  %v3467_v12 = vpop.eup %3466  ;;  %v879_v13 = vpop.xlane.xlu0 %878 }
 0x36b   : > { %3476 = vpow2.f32 %v1061_v41  ;;  %v945_v30 = vsub.f32 %v5285_v62, %v879_v13  ;;  %v946_v11 = vsub.f32 %v5286_v40, %v879_v13  ;;  %1361 = vmatprep.mubr.f32.mxu1 %v3467_v12  ;;  %v4660_v18 = vadd.f32 %v3467_v12, %v3465_v16  ;;  %v5288_v41 = vld [vmem:[#allocation17_spill] sm:$0xff]  ;;  %v5289_v12 = vld [vmem:[#allocation18_spill] sm:$0xff] }
 0x36c   : > { %3478 = vpow2.f32 %v1063_v45  ;;  %1362 = vmatmul.mubr.f32.gmra.mrb[52].mxu1 %v3465_v16 }
 0x36d   : > { %v3469_v60 = vpop.eup %3468  ;;  %v1065_v23 = vmul.f32 1.442695, %v945_v30  ;;  %v1067_v48 = vmul.f32 1.442695, %v946_v11  ;;  %v5290_v11 = vld [vmem:[#allocation19_spill] sm:$0xff] }
 0x36e   : > { %1082 = vadd.xlane.f32.xlu0 %v4425_v53  ;;  %1133 = vadd.xlane.f32.xlu1 %v4595_v3  ;;  %v3471_v63 = vpop.eup %3470  ;;  %v882_v9 = vpop.xlane.xlu1 %881 }
 0x36f   : > { %3480 = vpow2.f32 %v1065_v23  ;;  %v947_v57 = vsub.f32 %v5287_v37, %v882_v9  ;;  %v948_v62 = vsub.f32 %v5288_v41, %v882_v9  ;;  %1366 = vmatprep.mubr.f32.mxu1 %v3471_v63  ;;  %v4666_v13 = vadd.f32 %v3471_v63, %v3469_v60  ;;  %v5291_v37 = vld [vmem:[#allocation20_spill] sm:$0xff]  ;;  %v5292_v41 = vld [vmem:[#allocation21_spill] sm:$0xff] }
 0x370   : > { %3482 = vpow2.f32 %v1067_v48  ;;  %1367 = vmatmul.mubr.f32.gmra.mrb[54].mxu1 %v3469_v60 }
 0x371   : > { %v3473_v16 = vpop.eup %3472  ;;  %v1069_v45 = vmul.f32 1.442695, %v947_v57  ;;  %v1071_v30 = vmul.f32 1.442695, %v948_v62 }
 0x372   : > { %1136 = vadd.xlane.f32.xlu0 %v4605_v8  ;;  %1085 = vadd.xlane.f32.xlu1 %v4435_v15  ;;  %v3475_v53 = vpop.eup %3474  ;;  %v885_v3 = vpop.xlane.xlu0 %884 }
 0x373   : > { %3484 = vpow2.f32 %v1069_v45  ;;  %v949_v40 = vsub.f32 %v5289_v12, %v885_v3  ;;  %v950_v23 = vsub.f32 %v5290_v11, %v885_v3  ;;  %1371 = vmatprep.mubr.f32.mxu1 %v3475_v53  ;;  %v4672_v9 = vadd.f32 %v3475_v53, %v3473_v16  ;;  %v5293_v3 = vld [vmem:[#allocation22_spill] sm:$0xff] }
 0x374   : > { %3486 = vpow2.f32 %v1071_v30  ;;  %1372 = vmatmul.mubr.f32.gmra.mrb[56].mxu1 %v3473_v16 }
 0x375   : > { %v3477_v60 = vpop.eup %3476  ;;  %v1073_v48 = vmul.f32 1.442695, %v949_v40  ;;  %v1075_v63 = vmul.f32 1.442695, %v950_v23  ;;  %v5294_v40 = vld [vmem:[#allocation23_spill] sm:$0xff] }
 0x376   : > { %1088 = vadd.xlane.f32.xlu0 %v4445_v7  ;;  %1139 = vadd.xlane.f32.xlu1 %v4615_v14  ;;  %v3479_v15 = vpop.eup %3478  ;;  %v888_v8 = vpop.xlane.xlu1 %887 }
 0x377   : > { %3488 = vpow2.f32 %v1073_v48  ;;  %v951_v57 = vsub.f32 %v5291_v37, %v888_v8  ;;  %v952_v62 = vsub.f32 %v5292_v41, %v888_v8  ;;  %1376 = vmatprep.mubr.f32.mxu1 %v3479_v15  ;;  %v4678_v45 = vadd.f32 %v3479_v15, %v3477_v60  ;;  %v5295_v15 = vld [vmem:[#allocation24_spill] sm:$0xff]  ;;  %v5296_v37 = vld [vmem:[#allocation25_spill] sm:$0xff] }
 0x378   : > { %3490 = vpow2.f32 %v1075_v63  ;;  %1377 = vmatmul.mubr.f32.gmra.mrb[58].mxu1 %v3477_v60 }
 0x379   : > { %v3481_v16 = vpop.eup %3480  ;;  %v1077_v30 = vmul.f32 1.442695, %v951_v57  ;;  %v1079_v53 = vmul.f32 1.442695, %v952_v62 }
 0x37a   : > { %1142 = vadd.xlane.f32.xlu0 %v4625_v20  ;;  %1091 = vadd.xlane.f32.xlu1 %v4455_v10  ;;  %v3483_v7 = vpop.eup %3482  ;;  %v1859_v14 = vpop.xlane.xlu0 %1858 }
 0x37b   : > { %3492 = vpow2.f32 %v1077_v30  ;;  %v1953_v12 = vsub.f32 %v5293_v3, %v1859_v14  ;;  %v1954_v11 = vsub.f32 %v5294_v40, %v1859_v14  ;;  %1381 = vmatprep.mubr.f32.mxu1 %v3483_v7  ;;  %v4684_v23 = vadd.f32 %v3483_v7, %v3481_v16  ;;  %v5298_v14 = vld [vmem:[#allocation27_spill] sm:$0xff] }
 0x37c   : > { %3494 = vpow2.f32 %v1079_v53  ;;  %1382 = vmatmul.mubr.f32.gmra.mrb[60].mxu1 %v3481_v16  ;;  %v5297_v53 = vld [vmem:[#allocation26_spill] sm:$0xff] }
 0x37d   : > { %v3485_v60 = vpop.eup %3484  ;;  %v2017_v48 = vmul.f32 1.442695, %v1953_v12  ;;  %v2019_v63 = vmul.f32 1.442695, %v1954_v11 }
 0x37e   : > { %1094 = vadd.xlane.f32.xlu0 %v4465_v21  ;;  %1145 = vadd.xlane.f32.xlu1 %v4635_v27  ;;  %v3487_v10 = vpop.eup %3486  ;;  %v1862_v20 = vpop.xlane.xlu1 %1861 }
 0x37f   : > { %3496 = vpow2.f32 %v2017_v48  ;;  %v1955_v8 = vsub.f32 %v5295_v15, %v1862_v20  ;;  %v1956_v57 = vsub.f32 %v5296_v37, %v1862_v20  ;;  %1386 = vmatprep.mubr.f32.mxu1 %v3487_v10  ;;  %v4690_v41 = vadd.f32 %v3487_v10, %v3485_v60  ;;  %v5299_v48 = vld [vmem:[#allocation28_spill] sm:$0xff]  ;;  %v5300_v10 = vld [vmem:[#allocation29_spill] sm:$0xff] }
 0x380   : > { %3498 = vpow2.f32 %v2019_v63  ;;  %1387 = vmatmul.mubr.f32.gmra.mrb[62].mxu1 %v3485_v60 }
 0x381   : > { %v3489_v62 = vpop.eup %3488  ;;  %v2021_v16 = vmul.f32 1.442695, %v1955_v8  ;;  %v2023_v30 = vmul.f32 1.442695, %v1956_v57 }
 0x382   : > { %1148 = vadd.xlane.f32.xlu0 %v4645_v34  ;;  %1097 = vadd.xlane.f32.xlu1 %v4475_v24  ;;  %v3491_v21 = vpop.eup %3490  ;;  %v1865_v27 = vpop.xlane.xlu0 %1864 }
 0x383   : > { %3500 = vpow2.f32 %v2021_v16  ;;  %v1957_v7 = vsub.f32 %v5297_v53, %v1865_v27  ;;  %v1958_v3 = vsub.f32 %v5298_v14, %v1865_v27  ;;  %1391 = vmatprep.mubr.f32.mxu1 %v3491_v21  ;;  %v4696_v12 = vadd.f32 %v3491_v21, %v3489_v62  ;;  %v5301_v16 = vld [vmem:[#allocation30_spill] sm:$0xff] }
 0x384   : > { %3502 = vpow2.f32 %v2023_v30  ;;  %1392 = vmatmul.mubr.f32.gmra.mrb[64].mxu1 %v3489_v62 }
 0x385   : > { %v3493_v40 = vpop.eup %3492  ;;  %v2025_v11 = vmul.f32 1.442695, %v1957_v7  ;;  %v2027_v60 = vmul.f32 1.442695, %v1958_v3 }
 0x386   : > { %1100 = vadd.xlane.f32.xlu0 %v4485_v28  ;;  %1151 = vadd.xlane.f32.xlu1 %v4655_v19  ;;  %v3495_v24 = vpop.eup %3494  ;;  %v1868_v34 = vpop.xlane.xlu1 %1867 }
 0x387   : > { %3504 = vpow2.f32 %v2025_v11  ;;  %v1959_v63 = vsub.f32 %v5299_v48, %v1868_v34  ;;  %v1960_v20 = vsub.f32 %v5300_v10, %v1868_v34  ;;  %1396 = vmatprep.mubr.f32.mxu1 %v3495_v24  ;;  %v4702_v15 = vadd.f32 %v3495_v24, %v3493_v40  ;;  %v5302_v24 = vld [vmem:[#allocation31_spill] sm:$0xff]  ;;  %v5303_v48 = vld [vmem:[#allocation32_spill] sm:$0xff] }
 0x388   : > { %3506 = vpow2.f32 %v2027_v60  ;;  %1397 = vmatmul.mubr.f32.gmra.mrb[66].mxu1 %v3493_v40 }
 0x389   : > { %v3497_v8 = vpop.eup %3496  ;;  %v2029_v37 = vmul.f32 1.442695, %v1959_v63  ;;  %v2031_v57 = vmul.f32 1.442695, %v1960_v20 }
 0x38a   : > { %1106 = vadd.xlane.f32.xlu0 %v4505_v38  ;;  %1103 = vadd.xlane.f32.xlu1 %v4495_v33  ;;  %v3499_v28 = vpop.eup %3498  ;;  %v1871_v19 = vpop.xlane.xlu0 %1870 }
 0x38b   : > { %3508 = vpow2.f32 %v2029_v37  ;;  %v1961_v62 = vsub.f32 %v4384_v31, %v1871_v19  ;;  %v1962_v30 = vsub.f32 %v5301_v16, %v1871_v19  ;;  %2311 = vmatprep.mubr.f32.mxu1 %v3499_v28  ;;  %v2145_v21 = vadd.f32 %v3499_v28, %v3497_v8  ;;  %v5304_v37 = vld [vmem:[#allocation33_spill] sm:$0xff] }
 0x38c   : > { %3510 = vpow2.f32 %v2031_v57  ;;  %2312 = vmatmul.mubr.f32.vlgmr.msra.gmra.mrb[68].mxu1 %v3497_v8 }
 0x38d   : > { %v3501_v27 = vpop.eup %3500  ;;  %v2033_v53 = vmul.f32 1.442695, %v1961_v62  ;;  %v2035_v7 = vmul.f32 1.442695, %v1962_v30 }
 0x38e   : > { %1154 = vadd.xlane.f32.xlu0 %v4660_v18  ;;  %1109 = vadd.xlane.f32.xlu1 %v4515_v42  ;;  %v3503_v38 = vpop.eup %3502  ;;  %v1874_v33 = vpop.xlane.xlu1 %1873 }
 0x38f   : > { %3512 = vpow2.f32 %v2033_v53  ;;  %v1963_v14 = vsub.f32 %v4392_v56, %v1874_v33  ;;  %v1964_v31 = vsub.f32 %v4394_v59, %v1874_v33  ;;  %2316 = vmatprep.mubr.f32.mxu1 %v3503_v38  ;;  %v2148_v3 = vadd.f32 %v3503_v38, %v3501_v27 }
 0x390   : > { %3514 = vpow2.f32 %v2035_v7  ;;  %2317 = vmatmul.mubr.f32.gmra.mrb[70].mxu1 %v3501_v27 }
 0x391   : > { %v3505_v40 = vpop.eup %3504  ;;  %v2037_v11 = vmul.f32 1.442695, %v1963_v14  ;;  %v2039_v60 = vmul.f32 1.442695, %v1964_v31 }
 0x392   : > { %1160 = vadd.xlane.f32.xlu0 %v4672_v9  ;;  %1157 = vadd.xlane.f32.xlu1 %v4666_v13  ;;  %v3507_v18 = vpop.eup %3506  ;;  %v1877_v42 = vpop.xlane.xlu0 %1876 }
 0x393   : > { %3516 = vpow2.f32 %v2037_v11  ;;  %v1965_v34 = vsub.f32 %v5302_v24, %v1877_v42  ;;  %v1966_v56 = vsub.f32 %v5303_v48, %v1877_v42  ;;  %2321 = vmatprep.mubr.f32.mxu1 %v3507_v18  ;;  %v2151_v59 = vadd.f32 %v3507_v18, %v3505_v40 }
 0x394   : > { %3518 = vpow2.f32 %v2039_v60  ;;  %2322 = vmatmul.mubr.f32.gmra.mrb[72].mxu1 %v3505_v40 }
 0x395   : > { %v3509_v63 = vpop.eup %3508  ;;  %v2041_v10 = vmul.f32 1.442695, %v1965_v34  ;;  %v2043_v20 = vmul.f32 1.442695, %v1966_v56  ;;  %v5306_v34 = vld [vmem:[#allocation35_spill] sm:$0xff] }
 0x396   : > { %2146 = vadd.xlane.f32.xlu0 %v2145_v21  ;;  %1163 = vadd.xlane.f32.xlu1 %v4678_v45  ;;  %v3511_v9 = vpop.eup %3510  ;;  %v1880_v8 = vpop.xlane.xlu1 %1879 }
 0x397   : > { %3520 = vpow2.f32 %v2041_v10  ;;  %v1967_v13 = vsub.f32 %v4408_v2, %v1880_v8  ;;  %v1968_v57 = vsub.f32 %v5304_v37, %v1880_v8  ;;  %2326 = vmatprep.mubr.f32.mxu1 %v3511_v9  ;;  %v2154_v28 = vadd.f32 %v3511_v9, %v3509_v63  ;;  %v5307_v8 = vld [vmem:[#allocation36_spill] sm:$0xff] }
 0x398   : > { %3522 = vpow2.f32 %v2043_v20  ;;  %2327 = vmatmul.mubr.f32.gmra.mrb[74].mxu1 %v3509_v63 }
 0x399   : > { %v3513_v19 = vpop.eup %3512  ;;  %v2045_v62 = vmul.f32 1.442695, %v1967_v13  ;;  %v2047_v16 = vmul.f32 1.442695, %v1968_v57 }
 0x39a   : > { %2152 = vadd.xlane.f32.xlu0 %v2151_v59  ;;  %2149 = vadd.xlane.f32.xlu1 %v2148_v3  ;;  %v3515_v30 = vpop.eup %3514  ;;  %v5305_v3 = vld [vmem:[#allocation34_spill] sm:$0xff] }
 0x39b   : > { %v1883_v21 = vpop.xlane.xlu0 %1882  ;;  %3524 = vpow2.f32 %v2045_v62  ;;  %2331 = vmatprep.mubr.f32.mxu1 %v3515_v30  ;;  %v2157_v2 = vadd.f32 %v3515_v30, %v3513_v19  ;;  %v5308_v30 = vld [vmem:[#allocation37_spill] sm:$0xff] }
 0x39c   : > { %v1969_v45 = vsub.f32 %v4416_v44, %v1883_v21  ;;  %v1970_v27 = vsub.f32 %v4419_v0, %v1883_v21  ;;  %3526 = vpow2.f32 %v2047_v16  ;;  %2332 = vmatmul.mubr.f32.gmra.mrb[76].mxu1 %v3513_v19 }
 0x39d   : > { %v3517_v53 = vpop.eup %3516 }
 0x39e   : > { %v2049_v7 = vmul.f32 1.442695, %v1969_v45  ;;  %v2051_v38 = vmul.f32 1.442695, %v1970_v27  ;;  %2158 = vadd.xlane.f32.xlu0 %v2157_v2  ;;  %2155 = vadd.xlane.f32.xlu1 %v2154_v28  ;;  %v3519_v33 = vpop.eup %3518 }
 0x39f   : > { %v1886_v14 = vpop.xlane.xlu1 %1885  ;;  %2336 = vmatprep.mubr.f32.mxu1 %v3519_v33  ;;  %v2160_v44 = vadd.f32 %v3519_v33, %v3517_v53  ;;  %v5309_v33 = vld [vmem:[#allocation38_spill] sm:$0xff] }
 0x3a0   : > { %3528 = vpow2.f32 %v2049_v7  ;;  %v1971_v31 = vsub.f32 %v4427_v32, %v1886_v14  ;;  %v1972_v40 = vsub.f32 %v5305_v3, %v1886_v14  ;;  %2337 = vmatmul.mubr.f32.gmra.mrb[78].mxu1 %v3517_v53 }
 0x3a1   : > { %3530 = vpow2.f32 %v2051_v38  ;;  %v3521_v0 = vpop.eup %3520 }
 0x3a2   : > { %v2053_v11 = vmul.f32 1.442695, %v1971_v31  ;;  %v2055_v60 = vmul.f32 1.442695, %v1972_v40  ;;  %2161 = vadd.xlane.f32.xlu1 %v2160_v44  ;;  %v3523_v18 = vpop.eup %3522 }
 0x3a3   : > { %v1889_v42 = vpop.xlane.xlu0 %1888  ;;  %2341 = vmatprep.mubr.f32.mxu1 %v3523_v18  ;;  %v2163_v56 = vadd.f32 %v3523_v18, %v3521_v0 }
 0x3a4   : > { %3532 = vpow2.f32 %v2053_v11  ;;  %v1973_v24 = vsub.f32 %v4437_v17, %v1889_v42  ;;  %v1974_v48 = vsub.f32 %v5306_v34, %v1889_v42  ;;  %2342 = vmatmul.mubr.f32.gmra.mrb[80].mxu1 %v3521_v0 }
 0x3a5   : > { %3534 = vpow2.f32 %v2055_v60  ;;  %v3525_v32 = vpop.eup %3524  ;;  %2164 = vadd.xlane.f32.xlu0 %v2163_v56  ;;  %v5310_v60 = vld [vmem:[#allocation39_spill] sm:$0xff] }
 0x3a6   : > { %v2057_v59 = vmul.f32 1.442695, %v1973_v24  ;;  %v2059_v63 = vmul.f32 1.442695, %v1974_v48  ;;  %v3527_v10 = vpop.eup %3526 }
 0x3a7   : > { %v1892_v20 = vpop.xlane.xlu1 %1891  ;;  %2346 = vmatprep.mubr.f32.mxu1 %v3527_v10  ;;  %v2166_v37 = vadd.f32 %v3527_v10, %v3525_v32 }
 0x3a8   : > { %3536 = vpow2.f32 %v2057_v59  ;;  %v1975_v9 = vsub.f32 %v4447_v22, %v1892_v20  ;;  %v1976_v13 = vsub.f32 %v5307_v8, %v1892_v20  ;;  %2347 = vmatmul.mubr.f32.gmra.mrb[82].mxu1 %v3525_v32  ;;  %v5311_v59 = vld [vmem:[#allocation40_spill] sm:$0xff] }
 0x3a9   : > { %3538 = vpow2.f32 %v2059_v63  ;;  %2167 = vadd.xlane.f32.xlu1 %v2166_v37 }
 0x3aa   : > { %v3529_v17 = vpop.eup %3528  ;;  %v2061_v57 = vmul.f32 1.442695, %v1975_v9  ;;  %v2063_v28 = vmul.f32 1.442695, %v1976_v13 }
 0x3ab   : > { %v3531_v19 = vpop.eup %3530  ;;  %v1895_v62 = vpop.xlane.xlu0 %1894 }
 0x3ac   : > { %3540 = vpow2.f32 %v2061_v57  ;;  %v1977_v16 = vsub.f32 %v4457_v26, %v1895_v62  ;;  %v1978_v21 = vsub.f32 %v5308_v30, %v1895_v62  ;;  %2351 = vmatprep.mubr.f32.mxu1 %v3531_v19  ;;  %v2169_v45 = vadd.f32 %v3531_v19, %v3529_v17 }
 0x3ad   : > { %3542 = vpow2.f32 %v2063_v28  ;;  %2352 = vmatmul.mubr.f32.gmra.mrb[84].mxu1 %v3529_v17  ;;  %v5312_v17 = vld [vmem:[#allocation41_spill] sm:$0xff] }
 0x3ae   : > { %v3533_v22 = vpop.eup %3532  ;;  %v2065_v27 = vmul.f32 1.442695, %v1977_v16  ;;  %v2067_v2 = vmul.f32 1.442695, %v1978_v21  ;;  %2170 = vadd.xlane.f32.xlu0 %v2169_v45  ;;  %v5313_v45 = vld [vmem:[#allocation42_spill] sm:$0xff] }
 0x3af   : > { %v3535_v53 = vpop.eup %3534  ;;  %v1898_v7 = vpop.xlane.xlu1 %1897 }
 0x3b0   : > { %3544 = vpow2.f32 %v2065_v27  ;;  %v1979_v38 = vsub.f32 %v4467_v29, %v1898_v7  ;;  %v1980_v14 = vsub.f32 %v5309_v33, %v1898_v7  ;;  %2356 = vmatprep.mubr.f32.mxu1 %v3535_v53  ;;  %v2172_v31 = vadd.f32 %v3535_v53, %v3533_v22 }
 0x3b1   : > { %3546 = vpow2.f32 %v2067_v2  ;;  %2357 = vmatmul.mubr.f32.gmra.mrb[86].mxu1 %v3533_v22 }
 0x3b2   : > { %v3537_v26 = vpop.eup %3536  ;;  %v2069_v3 = vmul.f32 1.442695, %v1979_v38  ;;  %v2071_v40 = vmul.f32 1.442695, %v1980_v14  ;;  %2173 = vadd.xlane.f32.xlu1 %v2172_v31 }
 0x3b3   : > { %v3539_v44 = vpop.eup %3538  ;;  %v1901_v0 = vpop.xlane.xlu0 %1900 }
 0x3b4   : > { %3548 = vpow2.f32 %v2069_v3  ;;  %v1981_v11 = vsub.f32 %v4477_v35, %v1901_v0  ;;  %v1982_v18 = vsub.f32 %v5310_v60, %v1901_v0  ;;  %2361 = vmatprep.mubr.f32.mxu1 %v3539_v44  ;;  %v4733_v42 = vadd.f32 %v3539_v44, %v3537_v26 }
 0x3b5   : > { %3550 = vpow2.f32 %v2071_v40  ;;  %2362 = vmatmul.mubr.f32.gmra.mrb[88].mxu1 %v3537_v26 }
 0x3b6   : > { %v3541_v29 = vpop.eup %3540  ;;  %v2073_v24 = vmul.f32 1.442695, %v1981_v11  ;;  %v2075_v34 = vmul.f32 1.442695, %v1982_v18 }
 0x3b7   : > { %v3543_v48 = vpop.eup %3542  ;;  %v1904_v56 = vpop.xlane.xlu1 %1903 }
 0x3b8   : > { %3552 = vpow2.f32 %v2073_v24  ;;  %v1983_v32 = vsub.f32 %v4487_v39, %v1904_v56  ;;  %v1984_v63 = vsub.f32 %v5311_v59, %v1904_v56  ;;  %2366 = vmatprep.mubr.f32.mxu1 %v3543_v48  ;;  %v4737_v10 = vadd.f32 %v3543_v48, %v3541_v29 }
 0x3b9   : > { %3554 = vpow2.f32 %v2075_v34  ;;  %2367 = vmatmul.mubr.f32.gmra.mrb[90].mxu1 %v3541_v29 }
 0x3ba   : > { %v3545_v35 = vpop.eup %3544  ;;  %v2077_v20 = vmul.f32 1.442695, %v1983_v32  ;;  %v2079_v9 = vmul.f32 1.442695, %v1984_v63 }
 0x3bb   : > { %v3547_v8 = vpop.eup %3546  ;;  %v1907_v13 = vpop.xlane.xlu0 %1906 }
 0x3bc   : > { %3556 = vpow2.f32 %v2077_v20  ;;  %v1985_v37 = vsub.f32 %v4497_v43, %v1907_v13  ;;  %v1986_v57 = vsub.f32 %v5312_v17, %v1907_v13  ;;  %2371 = vmatprep.mubr.f32.mxu1 %v3547_v8  ;;  %v4741_v28 = vadd.f32 %v3547_v8, %v3545_v35  ;;  %v5314_v13 = vld [vmem:[#allocation43_spill] sm:$0xff] }
 0x3bd   : > { %3558 = vpow2.f32 %v2079_v9  ;;  %2372 = vmatmul.mubr.f32.gmra.mrb[92].mxu1 %v3545_v35 }
 0x3be   : > { %v3549_v39 = vpop.eup %3548  ;;  %v2081_v19 = vmul.f32 1.442695, %v1985_v37  ;;  %v2083_v62 = vmul.f32 1.442695, %v1986_v57 }
 0x3bf   : > { %v3551_v16 = vpop.eup %3550  ;;  %v1910_v30 = vpop.xlane.xlu1 %1909 }
 0x3c0   : > { %3560 = vpow2.f32 %v2081_v19  ;;  %v1987_v21 = vsub.f32 %v4507_v47, %v1910_v30  ;;  %v1988_v22 = vsub.f32 %v5313_v45, %v1910_v30  ;;  %2376 = vmatprep.mubr.f32.mxu1 %v3551_v16  ;;  %v4745_v27 = vadd.f32 %v3551_v16, %v3549_v39  ;;  %v5315_v16 = vld [vmem:[#allocation44_spill] sm:$0xff] }
 0x3c1   : > { %3562 = vpow2.f32 %v2083_v62  ;;  %2377 = vmatmul.mubr.f32.gmra.mrb[94].mxu1 %v3549_v39 }
 0x3c2   : > { %v3553_v43 = vpop.eup %3552  ;;  %v2085_v2 = vmul.f32 1.442695, %v1987_v21  ;;  %v2087_v53 = vmul.f32 1.442695, %v1988_v22 }
 0x3c3   : > { %v3555_v7 = vpop.eup %3554  ;;  %v1913_v38 = vpop.xlane.xlu0 %1912 }
 0x3c4   : > { %3564 = vpow2.f32 %v2085_v2  ;;  %v1989_v33 = vsub.f32 %v4517_v50, %v1913_v38  ;;  %v1990_v14 = vsub.f32 %v4519_v6, %v1913_v38  ;;  %2381 = vmatprep.mubr.f32.mxu1 %v3555_v7  ;;  %v4749_v31 = vadd.f32 %v3555_v7, %v3553_v43 }
 0x3c5   : > { %3566 = vpow2.f32 %v2087_v53  ;;  %2382 = vmatmul.mubr.f32.gmra.mrb[96].mxu1 %v3553_v43 }
 0x3c6   : > { %v3557_v47 = vpop.eup %3556  ;;  %v2089_v26 = vmul.f32 1.442695, %v1989_v33  ;;  %v2091_v3 = vmul.f32 1.442695, %v1990_v14  ;;  %v5316_v33 = vld [vmem:[#allocation49_spill] sm:$0xff] }
 0x3c7   : > { %v3559_v40 = vpop.eup %3558  ;;  %v1916_v44 = vpop.xlane.xlu1 %1915 }
 0x3c8   : > { %3568 = vpow2.f32 %v2089_v26  ;;  %v1991_v0 = vsub.f32 %v4527_v52, %v1916_v44  ;;  %v1992_v11 = vsub.f32 %v4529_v5, %v1916_v44  ;;  %2386 = vmatprep.mubr.f32.mxu1 %v3559_v40  ;;  %v4753_v60 = vadd.f32 %v3559_v40, %v3557_v47  ;;  %v5317_v40 = vld [vmem:[#allocation50_spill] sm:$0xff] }
 0x3c9   : > { %3570 = vpow2.f32 %v2091_v3  ;;  %2387 = vmatmul.mubr.f32.gmra.mrb[98].mxu1 %v3557_v47 }
 0x3ca   : > { %v3561_v6 = vpop.eup %3560  ;;  %v2093_v50 = vmul.f32 1.442695, %v1991_v0  ;;  %v2095_v18 = vmul.f32 1.442695, %v1992_v11  ;;  %v5318_v0 = vld [vmem:[#allocation51_spill] sm:$0xff] }
 0x3cb   : > { %v3563_v29 = vpop.eup %3562  ;;  %v1919_v24 = vpop.xlane.xlu0 %1918 }
 0x3cc   : > { %3572 = vpow2.f32 %v2093_v50  ;;  %v1993_v34 = vsub.f32 %v4537_v55, %v1919_v24  ;;  %v1994_v48 = vsub.f32 %v4539_v46, %v1919_v24  ;;  %2391 = vmatprep.mubr.f32.mxu1 %v3563_v29  ;;  %v2193_v56 = vadd.f32 %v3563_v29, %v3561_v6 }
 0x3cd   : > { %3574 = vpow2.f32 %v2095_v18  ;;  %2392 = vmatmul.mubr.f32.gmra.mrb[100].mxu1 %v3561_v6 }
 0x3ce   : > { %v3565_v5 = vpop.eup %3564  ;;  %v2097_v52 = vmul.f32 1.442695, %v1993_v34  ;;  %v2099_v32 = vmul.f32 1.442695, %v1994_v48  ;;  %2194 = vadd.xlane.f32.xlu0 %v2193_v56  ;;  %v5319_v48 = vld [vmem:[#allocation52_spill] sm:$0xff] }
 0x3cf   : > { %v3567_v59 = vpop.eup %3566  ;;  %v1922_v63 = vpop.xlane.xlu1 %1921 }
 0x3d0   : > { %3576 = vpow2.f32 %v2097_v52  ;;  %v1995_v35 = vsub.f32 %v4547_v58, %v1922_v63  ;;  %v1996_v20 = vsub.f32 %v4549_v49, %v1922_v63  ;;  %2396 = vmatprep.mubr.f32.mxu1 %v3567_v59  ;;  %v2196_v9 = vadd.f32 %v3567_v59, %v3565_v5 }
 0x3d1   : > { %3578 = vpow2.f32 %v2099_v32  ;;  %2397 = vmatmul.mubr.f32.gmra.mrb[102].mxu1 %v3565_v5  ;;  %v5320_v5 = vld [vmem:[#allocation53_spill] sm:$0xff] }
 0x3d2   : > { %v3569_v46 = vpop.eup %3568  ;;  %v2101_v55 = vmul.f32 1.442695, %v1995_v35  ;;  %v2103_v8 = vmul.f32 1.442695, %v1996_v20  ;;  %1112 = vadd.xlane.f32.xlu0 %v5314_v13  ;;  %2197 = vadd.xlane.f32.xlu1 %v2196_v9  ;;  %v5322_v13 = vld [vmem:[#allocation55_spill] sm:$0xff] }
 0x3d3   : > { %v3571_v37 = vpop.eup %3570  ;;  %v1925_v17 = vpop.xlane.xlu0 %1924 }
 0x3d4   : > { %3580 = vpow2.f32 %v2101_v55  ;;  %v1997_v57 = vsub.f32 %v4557_v61, %v1925_v17  ;;  %v1998_v39 = vsub.f32 %v4559_v51, %v1925_v17  ;;  %2401 = vmatprep.mubr.f32.mxu1 %v3571_v37  ;;  %v2199_v58 = vadd.f32 %v3571_v37, %v3569_v46  ;;  %v5321_v55 = vld [vmem:[#allocation54_spill] sm:$0xff] }
 0x3d5   : > { %3582 = vpow2.f32 %v2103_v8  ;;  %2402 = vmatmul.mubr.f32.gmra.mrb[104].mxu1 %v3569_v46 }
 0x3d6   : > { %v3573_v49 = vpop.eup %3572  ;;  %v2105_v19 = vmul.f32 1.442695, %v1997_v57  ;;  %v2107_v62 = vmul.f32 1.442695, %v1998_v39  ;;  %2200 = vadd.xlane.f32.xlu0 %v2199_v58  ;;  %1115 = vadd.xlane.f32.xlu1 %v5315_v16 }
 0x3d7   : > { %v3575_v30 = vpop.eup %3574  ;;  %v1928_v21 = vpop.xlane.xlu1 %1927 }
 0x3d8   : > { %3584 = vpow2.f32 %v2105_v19  ;;  %v1999_v45 = vsub.f32 %v4567_v1, %v1928_v21  ;;  %v2000_v22 = vsub.f32 %v4569_v54, %v1928_v21  ;;  %2406 = vmatprep.mubr.f32.mxu1 %v3575_v30  ;;  %v2202_v61 = vadd.f32 %v3575_v30, %v3573_v49  ;;  %v5324_v30 = vld [vmem:[#allocation56_spill] sm:$0xff] }
 0x3d9   : > { %3586 = vpow2.f32 %v2107_v62  ;;  %2407 = vmatmul.mubr.f32.gmra.mrb[106].mxu1 %v3573_v49  ;;  %v5323_v62 = vld [vmem:[#allocation45_spill] sm:$0xff] }
 0x3da   : > { %v3577_v51 = vpop.eup %3576  ;;  %v2109_v43 = vmul.f32 1.442695, %v1999_v45  ;;  %v2111_v2 = vmul.f32 1.442695, %v2000_v22  ;;  %2176 = vadd.xlane.f32.xlu0 %v4733_v42  ;;  %2203 = vadd.xlane.f32.xlu1 %v2202_v61  ;;  %v5325_v45 = vld [vmem:[#allocation57_spill] sm:$0xff] }
 0x3db   : > { %v3579_v53 = vpop.eup %3578  ;;  %v1931_v7 = vpop.xlane.xlu0 %1930 }
 0x3dc   : > { %3588 = vpow2.f32 %v2109_v43  ;;  %v2001_v38 = vsub.f32 %v4577_v4, %v1931_v7  ;;  %v2002_v14 = vsub.f32 %v5316_v33, %v1931_v7  ;;  %2411 = vmatprep.mubr.f32.mxu1 %v3579_v53  ;;  %v2205_v1 = vadd.f32 %v3579_v53, %v3577_v51 }
 0x3dd   : > { %3590 = vpow2.f32 %v2111_v2  ;;  %2412 = vmatmul.mubr.f32.gmra.mrb[108].mxu1 %v3577_v51 }
 0x3de   : > { %v3581_v54 = vpop.eup %3580  ;;  %v2113_v47 = vmul.f32 1.442695, %v2001_v38  ;;  %v2115_v26 = vmul.f32 1.442695, %v2002_v14  ;;  %2206 = vadd.xlane.f32.xlu0 %v2205_v1  ;;  %2179 = vadd.xlane.f32.xlu1 %v4737_v10  ;;  %v5326_v38 = vld [vmem:[#allocation46_spill] sm:$0xff] }
 0x3df   : > { %v3583_v3 = vpop.eup %3582  ;;  %v1934_v42 = vpop.xlane.xlu1 %1933  ;;  %v5327_v1 = vld [vmem:[#allocation58_spill] sm:$0xff] }
 0x3e0   : > { %3592 = vpow2.f32 %v2113_v47  ;;  %v2003_v44 = vsub.f32 %v5317_v40, %v1934_v42  ;;  %v2004_v11 = vsub.f32 %v5318_v0, %v1934_v42  ;;  %v4771_v4 = vpop.f32.mrb[4].mxu1  ;;  %2416 = vmatprep.mubr.f32.mxu1 %v3583_v3  ;;  %v2208_v6 = vadd.f32 %v3583_v3, %v3581_v54  ;;  %v5328_v47 = vld [vmem:[#allocation59_spill] sm:$0xff] }
 0x3e1   : > { %3594 = vpow2.f32 %v2115_v26  ;;  %v1245_v50 = vpop.f32.mrb[5].mxu1  ;;  %2417 = vmatmul.mubr.f32.gmra.mrb[110].mxu1 %v3581_v54 }
 0x3e2   : > { %v3585_v18 = vpop.eup %3584  ;;  %v2117_v29 = vmul.f32 1.442695, %v2003_v44  ;;  %v2119_v24 = vmul.f32 1.442695, %v2004_v11  ;;  %1166 = vadd.xlane.f32.xlu0 %v4684_v23  ;;  %2209 = vadd.xlane.f32.xlu1 %v2208_v6 }
 0x3e3   : > { %v3587_v10 = vpop.eup %3586  ;;  %v1937_v34 = vpop.xlane.xlu0 %1936 }
 0x3e4   : > { %3596 = vpow2.f32 %v2117_v29  ;;  %v2005_v56 = vsub.f32 %v5319_v48, %v1937_v34  ;;  %v2006_v52 = vsub.f32 %v5320_v5, %v1937_v34  ;;  %v4776_v32 = vpop.f32.mrb[6].mxu1  ;;  %2421 = vmatprep.mubr.f32.mxu1 %v3587_v10  ;;  %v2211_v59 = vadd.f32 %v3587_v10, %v3585_v18 }
 0x3e5   : > { %3598 = vpow2.f32 %v2119_v24  ;;  %v1250_v63 = vpop.f32.mrb[7].mxu1  ;;  %2422 = vmatmul.mubr.f32.gmra.mrb[112].mxu1 %v3585_v18  ;;  %v5329_v18 = vld [vmem:[#allocation8_spill] sm:$0xff]  ;;  %v5330_v24 = vld [vmem:[#allocation9_spill] sm:$0xff] }
 0x3e6   : > { %v3589_v35 = vpop.eup %3588  ;;  %v2121_v20 = vmul.f32 1.442695, %v2005_v56  ;;  %v2123_v9 = vmul.f32 1.442695, %v2006_v52  ;;  %2212 = vadd.xlane.f32.xlu0 %v2211_v59  ;;  %1169 = vadd.xlane.f32.xlu1 %v4690_v41 }
 0x3e7   : > { %v3591_v23 = vpop.eup %3590  ;;  %v1940_v46 = vpop.xlane.xlu1 %1939 }
 0x3e8   : > { %3600 = vpow2.f32 %v2121_v20  ;;  %v2007_v8 = vsub.f32 %v5321_v55, %v1940_v46  ;;  %v2008_v37 = vsub.f32 %v5322_v13, %v1940_v46  ;;  %v4781_v17 = vpop.f32.mrb[8].mxu1  ;;  %2426 = vmatprep.mubr.f32.mxu1 %v3591_v23  ;;  %v2214_v57 = vadd.f32 %v3591_v23, %v3589_v35 }
 0x3e9   : > { %3602 = vpow2.f32 %v2123_v9  ;;  %v1255_v39 = vpop.f32.mrb[9].mxu1  ;;  %2427 = vmatmul.mubr.f32.gmra.mrb[114].mxu1 %v3589_v35 }
 0x3ea   : > { %v3593_v58 = vpop.eup %3592  ;;  %v2125_v49 = vmul.f32 1.442695, %v2007_v8  ;;  %v2127_v19 = vmul.f32 1.442695, %v2008_v37  ;;  %1118 = vadd.xlane.f32.xlu0 %v5323_v62  ;;  %2215 = vadd.xlane.f32.xlu1 %v2214_v57 }
 0x3eb   : > { %v3595_v41 = vpop.eup %3594  ;;  %v1943_v16 = vpop.xlane.xlu0 %1942 }
 0x3ec   : > { %3604 = vpow2.f32 %v2125_v49  ;;  %v2009_v21 = vsub.f32 %v5324_v30, %v1943_v16  ;;  %v2010_v22 = vsub.f32 %v5325_v45, %v1943_v16  ;;  %v4786_v61 = vpop.f32.mrb[10].mxu1  ;;  %2431 = vmatprep.mubr.f32.mxu1 %v3595_v41  ;;  %v2217_v51 = vadd.f32 %v3595_v41, %v3593_v58 }
 0x3ed   : > { %3606 = vpow2.f32 %v2127_v19  ;;  %v1260_v43 = vpop.f32.mrb[11].mxu1  ;;  %2432 = vmatmul.mubr.f32.gmra.mrb[116].mxu1 %v3593_v58 }
 0x3ee   : > { %v3597_v2 = vpop.eup %3596  ;;  %v2129_v53 = vmul.f32 1.442695, %v2009_v21  ;;  %v2131_v7 = vmul.f32 1.442695, %v2010_v22  ;;  %2218 = vadd.xlane.f32.xlu0 %v2217_v51  ;;  %1121 = vadd.xlane.f32.xlu1 %v5326_v38  ;;  %v5331_v22 = vld [vmem:[#allocation47_spill] sm:$0xff] }
 0x3ef   : > { %v3599_v33 = vpop.eup %3598  ;;  %v1946_v14 = vpop.xlane.xlu1 %1945 }
 0x3f0   : > { %3608 = vpow2.f32 %v2129_v53  ;;  %v2011_v54 = vsub.f32 %v5327_v1, %v1946_v14  ;;  %v2012_v26 = vsub.f32 %v5328_v47, %v1946_v14  ;;  %v4791_v3 = vpop.f32.mrb[12].mxu1  ;;  %2436 = vmatprep.mubr.f32.mxu1 %v3599_v33  ;;  %v2220_v42 = vadd.f32 %v3599_v33, %v3597_v2  ;;  %v5332_v33 = vld [vmem:[#allocation48_spill] sm:$0xff] }
 0x3f1   : > { %3610 = vpow2.f32 %v2131_v7  ;;  %v1265_v40 = vpop.f32.mrb[13].mxu1  ;;  %2437 = vmatmul.mubr.f32.gmra.mrb[118].mxu1 %v3597_v2 }
 0x3f2   : > { %v3601_v44 = vpop.eup %3600  ;;  %v2133_v0 = vmul.f32 1.442695, %v2011_v54  ;;  %v2135_v11 = vmul.f32 1.442695, %v2012_v26  ;;  %2182 = vadd.xlane.f32.xlu0 %v4741_v28  ;;  %2221 = vadd.xlane.f32.xlu1 %v2220_v42  ;;  %v4799_v28 = vld [vmem:[#allocation2] sm:$0xff] }
 0x3f3   : > { %v3603_v6 = vpop.eup %3602  ;;  %v1949_v50 = vpop.xlane.xlu0 %1948  ;;  %3200 = vmatprep.mubr.msk.f32.mxu0 %vm432_vm2, %v4799_v28 }
 0x3f4   : > { %3612 = vpow2.f32 %v2133_v0  ;;  %v2013_v29 = vsub.f32 %v5329_v18, %v1949_v50  ;;  %v2014_v10 = vsub.f32 %v5330_v24, %v1949_v50  ;;  %v4796_v34 = vpop.f32.mrb[14].mxu1  ;;  %2441 = vmatprep.mubr.f32.mxu1 %v3603_v6  ;;  %v2223_v48 = vadd.f32 %v3603_v6, %v3601_v44 }
 0x3f5   : > { %3614 = vpow2.f32 %v2135_v11  ;;  %v1270_v56 = vpop.f32.mrb[15].mxu1  ;;  %2442 = vmatmul.mubr.f32.gmra.mrb[120].mxu1 %v3601_v44 }
 0x3f6   : > { %v3605_v5 = vpop.eup %3604  ;;  %v2137_v52 = vmul.f32 1.442695, %v2013_v29  ;;  %v2139_v59 = vmul.f32 1.442695, %v2014_v10  ;;  %2224 = vadd.xlane.f32.xlu0 %v2223_v48  ;;  %2185 = vadd.xlane.f32.xlu1 %v4745_v27 }
 0x3f7   : > { %v3607_v63 = vpop.eup %3606  ;;  %v4801_v35 = vpop.xlane.xlu0 %1130 }
 0x3f8   : > { %v1952_v20 = vpop.xlane.xlu1 %1951  ;;  %3616 = vpow2.f32 %v2137_v52  ;;  %v4807_v46 = vpop.f32.mrb[16].mxu1  ;;  %2446 = vmatprep.mubr.f32.mxu1 %v3607_v63  ;;  %v2226_v55 = vadd.f32 %v3607_v63, %v3605_v5 }
 0x3f9   : > { %v2015_v9 = vsub.f32 %v4647_v25, %v1952_v20  ;;  %v2016_v23 = vsub.f32 %v4649_v36, %v1952_v20  ;;  %3618 = vpow2.f32 %v2139_v59  ;;  %v1275_v27 = vpop.f32.mrb[17].mxu1  ;;  %2447 = vmatmul.mubr.f32.gmra.mrb[122].mxu1 %v3605_v5 }
 0x3fa   : > { %v3609_v8 = vpop.eup %3608  ;;  %1172 = vadd.xlane.f32.xlu0 %v4696_v12  ;;  %2227 = vadd.xlane.f32.xlu1 %v2226_v55 }
 0x3fb   : > { %v2141_v13 = vmul.f32 1.442695, %v2015_v9  ;;  %v2143_v37 = vmul.f32 1.442695, %v2016_v23  ;;  %v3611_v57 = vpop.eup %3610  ;;  %v1083_v39 = vpop.xlane.xlu0 %1082 }
 0x3fc   : > { %v4810_v58 = vpop.xlane.xlu1 %1133  ;;  %v4812_v25 = vpop.f32.mrb[18].mxu1  ;;  %2451 = vmatprep.mubr.f32.mxu1 %v3611_v57  ;;  %v2229_v36 = vadd.f32 %v3611_v57, %v3609_v8 }
 0x3fd   : > { %3620 = vpow2.f32 %v2141_v13  ;;  %v1280_v49 = vpop.f32.mrb[19].mxu1  ;;  %2452 = vmatmul.mubr.f32.gmra.mrb[124].mxu1 %v3609_v8 }
 0x3fe   : > { %3622 = vpow2.f32 %v2143_v37  ;;  %v3613_v19 = vpop.eup %3612  ;;  %2230 = vadd.xlane.f32.xlu0 %v2229_v36  ;;  %1175 = vadd.xlane.f32.xlu1 %v4702_v15 }
 0x3ff   : > { %v3615_v62 = vpop.eup %3614  ;;  %3624 = vrcp.f32 %v1083_v39  ;;  %v4815_v12 = vpop.xlane.xlu0 %1136 }
 0x400   : > { %v1086_v41 = vpop.xlane.xlu1 %1085  ;;  %v4817_v16 = vpop.f32.mrb[20].mxu1  ;;  %2456 = vmatprep.mubr.f32.mxu1 %v3615_v62  ;;  %v2232_v30 = vadd.f32 %v3615_v62, %v3613_v19 }
 0x401   : > { %3626 = vrcp.f32 %v1086_v41  ;;  %v1285_v21 = vpop.f32.mrb[21].mxu1  ;;  %2457 = vmatmul.mubr.f32.gmra.mrb[126].mxu1 %v3613_v19 }
 0x402   : > { %v3617_v45 = vpop.eup %3616  ;;  %1124 = vadd.xlane.f32.xlu0 %v5331_v22  ;;  %2233 = vadd.xlane.f32.xlu1 %v2232_v30 }
 0x403   : > { %v3619_v51 = vpop.eup %3618  ;;  %v1089_v43 = vpop.xlane.xlu0 %1088 }
 0x404   : > { %v4820_v2 = vpop.xlane.xlu1 %1139  ;;  %v4822_v15 = vpop.f32.mrb[22].mxu1  ;;  %2461 = vmatprep.mubr.f32.mxu1 %v3619_v51  ;;  %v2235_v53 = vadd.f32 %v3619_v51, %v3617_v45  ;;  %3628 = vrcp.f32 %v1089_v43 }
 0x405   : > { %v1290_v7 = vpop.f32.mrb[23].mxu1  ;;  %2462 = vmatmul.mubr.f32.gmra.mrb[128].mxu1 %v3617_v45 }
 0x406   : > { %2236 = vadd.xlane.f32.xlu0 %v2235_v53  ;;  %1127 = vadd.xlane.f32.xlu1 %v5332_v33 }
 0x407   : > { %v3621_v38 = vpop.eup %3620  ;;  %v4825_v1 = vpop.xlane.xlu0 %1142 }
 0x408   : > { %v3623_v14 = vpop.eup %3622  ;;  %v1092_v54 = vpop.xlane.xlu1 %1091 }
 0x409   : > { %v4827_v47 = vpop.f32.mrb[24].mxu1  ;;  %2466 = vmatprep.mubr.f32.mxu1 %v3623_v14  ;;  %v2238_v26 = vadd.f32 %v3623_v14, %v3621_v38  ;;  %v3625_v42 = vpop.eup %3624  ;;  %3630 = vrcp.f32 %v1092_v54 }
 0x40a   : > { %v1295_v40 = vpop.f32.mrb[25].mxu1  ;;  %2467 = vmatmul.mubr.f32.gmra.mrb[130].mxu1 %v3621_v38  ;;  %2188 = vadd.xlane.f32.xlu0 %v4749_v31  ;;  %v4833_v6 = vmul.f32 %v3625_v42, %v4771_v4 }
 0x40b   : > { %2239 = vadd.xlane.f32.xlu1 %v2238_v26  ;;  %v3627_v44 = vpop.eup %3626  ;;  %v1095_v0 = vpop.xlane.xlu0 %1094 }
 0x40c   : > { %v4830_v11 = vpop.xlane.xlu1 %1145  ;;  %v4836_v50 = vmul.f32 %v3627_v44, %v4776_v32  ;;  %v4838_v18 = vpop.f32.mrb[26].mxu1  ;;  %3632 = vrcp.f32 %v1095_v0 }
 0x40d   : > { %v1300_v29 = vpop.f32.mrb[27].mxu1 }
 0x40e   : > { %v3253_v24 = vpack.c.bf16 %v4836_v50, %v4833_v6  ;;  %v3629_v56 = vpop.eup %3628 }
 0x40f   : > { %2191 = vadd.xlane.f32.xlu1 %v4753_v60  ;;  %v4843_v31 = vpop.xlane.xlu0 %1148  ;;  %v4845_v48 = vpop.f32.mrb[28].mxu1  ;;  %v4850_v59 = vmul.f32 %v3629_v56, %v4781_v17 }
 0x410   : > { %v1098_v10 = vpop.xlane.xlu1 %1097  ;;  %v1305_v4 = vpop.f32.mrb[29].mxu1 }
 0x411   : > { %3634 = vrcp.f32 %v1098_v10 }
 0x413   : > { %v3631_v5 = vpop.eup %3630  ;;  %v1101_v32 = vpop.xlane.xlu0 %1100 }
 0x414   : > { %v4847_v52 = vpop.xlane.xlu1 %1151  ;;  %v4853_v60 = vmul.f32 %v3631_v5, %v4786_v61  ;;  %v4855_v63 = vpop.f32.mrb[30].mxu1  ;;  %3636 = vrcp.f32 %v1101_v32 }
 0x415   : > { %v1310_v20 = vpop.f32.mrb[31].mxu1  ;;  %3638 = vrcp.f32 %v4801_v35 }
 0x416   : > { %v3259_v9 = vpack.c.bf16 %v4853_v60, %v4850_v59  ;;  %v3633_v8 = vpop.eup %3632 }
 0x417   : > { %v1107_v55 = vpop.xlane.xlu0 %1106  ;;  %v4860_v27 = vpop.f32.mrb[32].mxu1  ;;  %v4864_v37 = vmul.f32 %v3633_v8, %v4791_v3 }
 0x418   : > { %v1104_v23 = vpop.xlane.xlu1 %1103  ;;  %v1315_v17 = vpop.f32.mrb[33].mxu1 }
 0x419   : > { %3640 = vrcp.f32 %v1104_v23 }
 0x41a   : > { %3642 = vrcp.f32 %v4810_v58 }
 0x41b   : > { %v3635_v61 = vpop.eup %3634  ;;  %3644 = vrcp.f32 %v1107_v55  ;;  %v4867_v39 = vpop.f32.mrb[34].mxu1 }
 0x41c   : > { %v1110_v13 = vpop.xlane.xlu1 %1109  ;;  %v1439_v57 = vmul.f32 %v3635_v61, %v4796_v34  ;;  %v1320_v35 = vpop.f32.mrb[35].mxu1 }
 0x41d   : > { %3646 = vrcp.f32 %v1110_v13  ;;  %v1155_v56 = vpop.xlane.xlu0 %1154 }
 0x41e   : > { %v3265_v36 = vpack.c.bf16 %v1439_v57, %v4864_v37  ;;  %v3637_v19 = vpop.eup %3636  ;;  %3648 = vrcp.f32 %v4815_v12 }
 0x41f   : > { %v1323_v49 = vpop.f32.mrb[36].mxu1  ;;  %v3639_v62 = vpop.eup %3638  ;;  %3650 = vrcp.f32 %v4820_v2  ;;  %v4875_v34 = vmul.f32 %v3637_v19, %v4807_v46 }
 0x420   : > { %2537 = vrot.lane.b32.xlu0 %v4799_v28, %s3866_s6  ;;  %v1325_v58 = vpop.f32.mrb[37].mxu1  ;;  %v1450_v22 = vmul.f32 %v3639_v62, %v1323_v49  ;;  %3652 = vrcp.f32 %v4825_v1  ;;  %v1158_v4 = vpop.xlane.xlu1 %1157 }
 0x421   : > { %3654 = vrcp.f32 %v4830_v11  ;;  %v1161_v20 = vpop.xlane.xlu0 %1160 }
 0x422   : > { %3656 = vrcp.f32 %v4843_v31 }
 0x423   : > { %v3641_v3 = vpop.eup %3640  ;;  %v1328_v21 = vpop.f32.mrb[38].mxu1  ;;  %3658 = vrcp.f32 %v4847_v52 }
 0x424   : > { %v3643_v41 = vpop.eup %3642  ;;  %v1441_v30 = vmul.f32 %v3641_v3, %v4812_v25  ;;  %v1330_v43 = vpop.f32.mrb[39].mxu1  ;;  %3660 = vrcp.f32 %v1155_v56 }
 0x425   : > { %v3645_v45 = vpop.eup %3644  ;;  %v1451_v51 = vmul.f32 %v3643_v41, %v1328_v21  ;;  %3662 = vrcp.f32 %v1158_v4  ;;  %v1164_v8 = vpop.xlane.xlu1 %1163 }
 0x426   : > { %v3271_v2 = vpack.c.bf16 %v1441_v30, %v4875_v34  ;;  %v4886_v46 = vmul.f32 %v3645_v45, %v4817_v16  ;;  %3664 = vrcp.f32 %v1161_v20  ;;  %v2147_v57 = vpop.xlane.xlu0 %2146 }
 0x427   : > { %v3647_v53 = vpop.eup %3646  ;;  %v3250_v7 = vpack.c.bf16 %v1451_v51, %v1450_v22  ;;  %v1333_v38 = vpop.f32.mrb[40].mxu1  ;;  %3666 = vrcp.f32 %v1164_v8 }
 0x428   : > { %v4889_v25 = vmul.f32 %v3647_v53, %v4822_v15  ;;  %v1335_v33 = vpop.f32.mrb[41].mxu1  ;;  %v3649_v16 = vpop.eup %3648  ;;  %3668 = vrcp.f32 %v2147_v57 }
 0x429   : > { %3252 = vmatprep.subr.msk.bf16.mxu0 %vm4880_vm3, %v3250_v7  ;;  %v3651_v54 = vpop.eup %3650  ;;  %v1452_v15 = vmul.f32 %v3649_v16, %v1333_v38  ;;  %v2150_v62 = vpop.xlane.xlu1 %2149 }
 0x42a   : > { %3255 = vmatpush3.bf16.xpose.msk.msra.mxu0 %vm4880_vm3, %v3253_v24  ;;  %v3277_v14 = vpack.c.bf16 %v4889_v25, %v4886_v46  ;;  %v3653_v11 = vpop.eup %3652  ;;  %v2153_v34 = vpop.xlane.xlu0 %2152  ;;  %3670 = vrcp.f32 %v2150_v62 }
 0x42b   : > { %v1338_v26 = vpop.f32.mrb[42].mxu1  ;;  %v3655_v6 = vpop.eup %3654  ;;  %3672 = vrcp.f32 %v2153_v34 }
 0x42c   : > { %v1453_v42 = vmul.f32 %v3651_v54, %v1338_v26  ;;  %v1340_v40 = vpop.f32.mrb[43].mxu1  ;;  %v3657_v52 = vpop.eup %3656 }
 0x42d   : > { %v3659_v59 = vpop.eup %3658  ;;  %v2156_v51 = vpop.xlane.xlu1 %2155 }
 0x42e   : > { %v3256_v44 = vpack.c.bf16 %v1453_v42, %v1452_v15  ;;  %v3661_v37 = vpop.eup %3660  ;;  %v2159_v7 = vpop.xlane.xlu0 %2158  ;;  %3674 = vrcp.f32 %v2156_v51 }
 0x42f   : > { %v1343_v1 = vpop.f32.mrb[44].mxu1  ;;  %v3663_v35 = vpop.eup %3662 }
 0x430   : > { %v1345_v0 = vpop.f32.mrb[45].mxu1  ;;  %3258 = vmatprep.subr.msk.bf16.mxu0 %vm4880_vm3, %v3256_v44  ;;  %v1454_v29 = vmul.f32 %v3653_v11, %v1343_v1  ;;  %v3665_v21 = vpop.eup %3664 }
 0x431   : > { %v3667_v45 = vpop.eup %3666  ;;  %v2162_v33 = vpop.xlane.xlu1 %2161 }
 0x432   : > { %3261 = vmatpush3.bf16.xpose.msk.msra.mxu0 %vm4880_vm3, %v3259_v9  ;;  %v2165_v16 = vpop.xlane.xlu0 %2164 }
 0x433   : > { %v1348_v50 = vpop.f32.mrb[46].mxu1 }
 0x434   : > { %v1455_v24 = vmul.f32 %v3655_v6, %v1348_v50  ;;  %v1350_v10 = vpop.f32.mrb[47].mxu1 }
 0x436   : > { %v3262_v5 = vpack.c.bf16 %v1455_v24, %v1454_v29  ;;  %v2168_v26 = vpop.xlane.xlu1 %2167  ;;  %v3669_v29 = vpop.eup %3668 }
 0x437   : > { %v1353_v32 = vpop.f32.mrb[48].mxu1 }
 0x438   : > { %v1355_v31 = vpop.f32.mrb[49].mxu1  ;;  %3264 = vmatprep.subr.msk.bf16.mxu0 %vm4880_vm3, %v3262_v5  ;;  %v1456_v9 = vmul.f32 %v3657_v52, %v1353_v32  ;;  %v3671_v32 = vpop.eup %3670 }
 0x43a   : > { %3267 = vmatpush3.bf16.xpose.msk.msra.mxu0 %vm4880_vm3, %v3265_v36 }
 0x43b   : > { %v1358_v60 = vpop.f32.mrb[50].mxu1  ;;  %v2171_v15 = vpop.xlane.xlu0 %2170 }
 0x43c   : > { %v1457_v23 = vmul.f32 %v3659_v59, %v1358_v60  ;;  %v1360_v55 = vpop.f32.mrb[51].mxu1 }
 0x43e   : > { %v3268_v17 = vpack.c.bf16 %v1457_v23, %v1456_v9  ;;  %v3673_v23 = vpop.eup %3672 }
 0x43f   : > { %v1363_v61 = vpop.f32.mrb[52].mxu1  ;;  %v4925_v44 = vpop.xlane.xlu1 %2173 }
 0x440   : > { %v1365_v13 = vpop.f32.mrb[53].mxu1  ;;  %3270 = vmatprep.subr.msk.bf16.mxu0 %vm4880_vm3, %v3268_v17  ;;  %v1458_v49 = vmul.f32 %v3661_v37, %v1363_v61  ;;  %v3675_v37 = vpop.eup %3674 }
 0x442   : > { %3273 = vmatpush3.bf16.xpose.msk.msra.mxu0 %vm4880_vm3, %v3271_v2 }
 0x443   : > { %v1368_v36 = vpop.f32.mrb[54].mxu1 }
 0x444   : > { %v1459_v19 = vmul.f32 %v3663_v35, %v1368_v36  ;;  %v1370_v58 = vpop.f32.mrb[55].mxu1 }
 0x446   : > { %v3274_v3 = vpack.c.bf16 %v1459_v19, %v1458_v49 }
 0x447   : > { %v1373_v41 = vpop.f32.mrb[56].mxu1 }
 0x448   : > { %v1375_v30 = vpop.f32.mrb[57].mxu1  ;;  %3276 = vmatprep.subr.msk.bf16.mxu0 %vm4880_vm3, %v3274_v3  ;;  %v1460_v43 = vmul.f32 %v3665_v21, %v1373_v41 }
 0x44a   : > { %3279 = vmatpush3.bf16.xpose.msk.msra.mxu0 %vm4880_vm3, %v3277_v14 }
 0x44b   : > { %v1378_v22 = vpop.f32.mrb[58].mxu1 }
 0x44c   : > { %v1461_v2 = vmul.f32 %v3667_v45, %v1378_v22  ;;  %v1380_v53 = vpop.f32.mrb[59].mxu1 }
 0x44e   : > { %v3280_v46 = vpack.c.bf16 %v1461_v2, %v1460_v43 }
 0x44f   : > { %v4917_v25 = vpop.f32.mrb[60].mxu1 }
 0x450   : > { %v1385_v38 = vpop.f32.mrb[61].mxu1  ;;  %3282 = vmatprep.subr.msk.bf16.mxu0 %vm4880_vm3, %v3280_v46 }
 0x453   : > { %v4921_v54 = vpop.f32.mrb[62].mxu1 }
 0x454   : > { %v1390_v14 = vpop.f32.mrb[63].mxu1 }
 0x457   : > { %v4923_v42 = vpop.f32.mrb[64].mxu1 }
 0x458   : > { %v1395_v40 = vpop.f32.mrb[65].mxu1 }
 0x45b   : > { %v4927_v1 = vpop.xlane.xlu0 %2194  ;;  %v4929_v0 = vpop.f32.mrb[66].mxu1 }
 0x45c   : > { %v1400_v11 = vpop.f32.mrb[67].mxu1 }
 0x45f   : > { %v1113_v6 = vpop.xlane.xlu0 %1112  ;;  %v4931_v50 = vpop.xlane.xlu1 %2197 }
 0x460   : > { %v2313_v24 = vpop.f32.mrb[68].mxu1  ;;  %3676 = vrcp.f32 %v1113_v6 }
 0x461   : > { %v4933_v10 = vmul.f32 %v3669_v29, %v2313_v24  ;;  %v2315_v56 = vpop.f32.mrb[69].mxu1 }
 0x463   : > { %v4935_v4 = vpop.xlane.xlu0 %2200  ;;  %v1116_v5 = vpop.xlane.xlu1 %1115 }
 0x464   : > { %v2318_v31 = vpop.f32.mrb[70].mxu1  ;;  %3678 = vrcp.f32 %v1116_v5 }
 0x465   : > { %v4937_v52 = vmul.f32 %v3671_v32, %v2318_v31  ;;  %v2320_v59 = vpop.f32.mrb[71].mxu1  ;;  %3680 = vrcp.f32 %v2159_v7 }
 0x466   : > { %3682 = vrcp.f32 %v2162_v33 }
 0x467   : > { %v3205_v60 = vpack.c.bf16 %v4937_v52, %v4933_v10  ;;  %v2177_v20 = vpop.xlane.xlu0 %2176  ;;  %v4941_v9 = vpop.xlane.xlu1 %2203  ;;  %3684 = vrcp.f32 %v2165_v16 }
 0x468   : > { %v2323_v55 = vpop.f32.mrb[72].mxu1  ;;  %3686 = vrcp.f32 %v2168_v26 }
 0x469   : > { %v4943_v8 = vmul.f32 %v3673_v23, %v2323_v55  ;;  %v2325_v17 = vpop.f32.mrb[73].mxu1 }
 0x46a   : > { %v3677_v35 = vpop.eup %3676 }
 0x46b   : > { %v4945_v61 = vpop.xlane.xlu0 %2206  ;;  %v2180_v13 = vpop.xlane.xlu1 %2179  ;;  %v1444_v34 = vmul.f32 %v3677_v35, %v4827_v47 }
 0x46c   : > { %v2328_v57 = vpop.f32.mrb[74].mxu1 }
 0x46d   : > { %v4947_v36 = vmul.f32 %v3675_v37, %v2328_v57  ;;  %v2330_v49 = vpop.f32.mrb[75].mxu1 }
 0x46e   : > { %v3679_v19 = vpop.eup %3678 }
 0x46f   : > { %v3211_v58 = vpack.c.bf16 %v4947_v36, %v4943_v8  ;;  %v1167_v62 = vpop.xlane.xlu0 %1166  ;;  %v4951_v3 = vpop.xlane.xlu1 %2209  ;;  %v1445_v30 = vmul.f32 %v3679_v19, %v4838_v18 }
 0x470   : > { %v3681_v41 = vpop.eup %3680  ;;  %v2333_v21 = vpop.f32.mrb[76].mxu1  ;;  %3688 = vrcp.f32 %v1167_v62 }
 0x471   : > { %v4955_v45 = vmul.f32 %v3681_v41, %v2333_v21  ;;  %v2335_v22 = vpop.f32.mrb[77].mxu1  ;;  %v3283_v51 = vpack.c.bf16 %v1445_v30, %v1444_v34  ;;  %v3683_v53 = vpop.eup %3682 }
 0x472   : > { %v3685_v16 = vpop.eup %3684 }
 0x473   : > { %v4957_v43 = vpop.xlane.xlu0 %2212  ;;  %v1170_v2 = vpop.xlane.xlu1 %1169  ;;  %3285 = vmatpush3.bf16.xpose.msk.msra.mxu0 %vm4880_vm3, %v3283_v51 }
 0x474   : > { %v2338_v7 = vpop.f32.mrb[78].mxu1  ;;  %3690 = vrcp.f32 %v1170_v2  ;;  %v3687_v29 = vpop.eup %3686 }
 0x475   : > { %v4961_v46 = vmul.f32 %v3683_v53, %v2338_v7  ;;  %v2340_v47 = vpop.f32.mrb[79].mxu1  ;;  %3692 = vrcp.f32 %v2171_v15 }
 0x476   : > { %3694 = vrcp.f32 %v4925_v44 }
 0x477   : > { %v3217_v18 = vpack.c.bf16 %v4961_v46, %v4955_v45  ;;  %v1119_v38 = vpop.xlane.xlu0 %1118  ;;  %v4965_v33 = vpop.xlane.xlu1 %2215 }
 0x478   : > { %v2343_v14 = vpop.f32.mrb[80].mxu1  ;;  %3696 = vrcp.f32 %v1119_v38 }
 0x479   : > { %v4967_v26 = vmul.f32 %v3685_v16, %v2343_v14  ;;  %v2345_v40 = vpop.f32.mrb[81].mxu1 }
 0x47a   : > { %v3689_v15 = vpop.eup %3688 }
 0x47b   : > { %v4970_v11 = vpop.xlane.xlu0 %2218  ;;  %v1122_v6 = vpop.xlane.xlu1 %1121  ;;  %v1462_v17 = vmul.f32 %v3689_v15, %v4917_v25 }
 0x47c   : > { %v2348_v24 = vpop.f32.mrb[82].mxu1  ;;  %3698 = vrcp.f32 %v1122_v6 }
 0x47d   : > { %v4972_v56 = vmul.f32 %v3687_v29, %v2348_v24  ;;  %v2350_v5 = vpop.f32.mrb[83].mxu1  ;;  %3700 = vrcp.f32 %v2177_v20 }
 0x47e   : > { %v3691_v32 = vpop.eup %3690  ;;  %3702 = vrcp.f32 %v2180_v13 }
 0x47f   : > { %v3223_v31 = vpack.c.bf16 %v4972_v56, %v4967_v26  ;;  %v2183_v59 = vpop.xlane.xlu0 %2182  ;;  %v4976_v23 = vpop.xlane.xlu1 %2221  ;;  %v1463_v37 = vmul.f32 %v3691_v32, %v4921_v54 }
 0x480   : > { %v3693_v44 = vpop.eup %3692  ;;  %v2353_v55 = vpop.f32.mrb[84].mxu1  ;;  %3704 = vrcp.f32 %v2183_v59 }
 0x481   : > { %v4980_v57 = vmul.f32 %v3693_v44, %v2353_v55  ;;  %v2355_v35 = vpop.f32.mrb[85].mxu1  ;;  %v3286_v49 = vpack.c.bf16 %v1463_v37, %v1462_v17  ;;  %v3695_v62 = vpop.eup %3694 }
 0x482   : > { %v3697_v34 = vpop.eup %3696 }
 0x483   : > { %v4982_v19 = vpop.xlane.xlu0 %2224  ;;  %v2186_v20 = vpop.xlane.xlu1 %2185  ;;  %3288 = vmatprep.subr.msk.bf16.mxu0 %vm4880_vm3, %v3286_v49  ;;  %v1446_v2 = vmul.f32 %v3697_v34, %v4845_v48 }
 0x484   : > { %v2358_v41 = vpop.f32.mrb[86].mxu1  ;;  %3706 = vrcp.f32 %v2186_v20 }
 0x485   : > { %v4986_v30 = vmul.f32 %v3695_v62, %v2358_v41  ;;  %v2360_v21 = vpop.f32.mrb[87].mxu1 }
 0x486   : > { %v3699_v25 = vpop.eup %3698 }
 0x487   : > { %v3229_v54 = vpack.c.bf16 %v4986_v30, %v4980_v57  ;;  %v1173_v22 = vpop.xlane.xlu0 %1172  ;;  %v4990_v13 = vpop.xlane.xlu1 %2227  ;;  %v1447_v53 = vmul.f32 %v3699_v25, %v4855_v63 }
 0x488   : > { %v3701_v51 = vpop.eup %3700  ;;  %v2363_v7 = vpop.f32.mrb[88].mxu1  ;;  %3708 = vrcp.f32 %v1173_v22 }
 0x489   : > { %v4994_v47 = vmul.f32 %v3701_v51, %v2363_v7  ;;  %v2365_v38 = vpop.f32.mrb[89].mxu1  ;;  %v3289_v16 = vpack.c.bf16 %v1447_v53, %v1446_v2  ;;  %v3703_v6 = vpop.eup %3702 }
 0x48a   : > { %v3705_v32 = vpop.eup %3704 }
 0x48b   : > { %v4996_v14 = vpop.xlane.xlu0 %2230  ;;  %v1176_v40 = vpop.xlane.xlu1 %1175  ;;  %3291 = vmatpush3.bf16.xpose.msk.msra.mxu0 %vm4880_vm3, %v3289_v16 }
 0x48c   : > { %v2368_v29 = vpop.f32.mrb[90].mxu1  ;;  %3710 = vrcp.f32 %v1176_v40 }
 0x48d   : > { %v5000_v24 = vmul.f32 %v3703_v6, %v2368_v29  ;;  %v2370_v48 = vpop.f32.mrb[91].mxu1 }
 0x48e   : > { %v3707_v35 = vpop.eup %3706 }
 0x48f   : > { %v3235_v63 = vpack.c.bf16 %v5000_v24, %v4994_v47  ;;  %v1125_v15 = vpop.xlane.xlu0 %1124  ;;  %v5004_v5 = vpop.xlane.xlu1 %2233 }
 0x490   : > { %v2373_v59 = vpop.f32.mrb[92].mxu1  ;;  %3712 = vrcp.f32 %v1125_v15 }
 0x491   : > { %v5006_v44 = vmul.f32 %v3705_v32, %v2373_v59  ;;  %v2375_v55 = vpop.f32.mrb[93].mxu1 }
 0x492   : > { %v3709_v20 = vpop.eup %3708 }
 0x493   : > { %v5008_v17 = vpop.xlane.xlu0 %2236  ;;  %v1128_v37 = vpop.xlane.xlu1 %1127  ;;  %v1464_v2 = vmul.f32 %v3709_v20, %v4923_v42 }
 0x494   : > { %v2378_v49 = vpop.f32.mrb[94].mxu1  ;;  %3714 = vrcp.f32 %v1128_v37 }
 0x495   : > { %v5010_v62 = vmul.f32 %v3707_v35, %v2378_v49  ;;  %v2380_v41 = vpop.f32.mrb[95].mxu1  ;;  %3716 = vrcp.f32 %v4927_v1 }
 0x496   : > { %v3711_v34 = vpop.eup %3710  ;;  %3718 = vrcp.f32 %v4931_v50 }
 0x497   : > { %v3241_v21 = vpack.c.bf16 %v5010_v62, %v5006_v44  ;;  %v2189_v25 = vpop.xlane.xlu0 %2188  ;;  %v1465_v53 = vmul.f32 %v3711_v34, %v4929_v0 }
 0x498   : > { %v5014_v22 = vpop.xlane.xlu1 %2239  ;;  %v2383_v51 = vpop.f32.mrb[96].mxu1  ;;  %3720 = vrcp.f32 %v2189_v25 }
 0x499   : > { %v2385_v7 = vpop.f32.mrb[97].mxu1  ;;  %v3292_v38 = vpack.c.bf16 %v1465_v53, %v1464_v2 }
 0x49a   : > { %v3713_v1 = vpop.eup %3712 }
 0x49b   : > { %v5020_v40 = vpop.permute.xlu0 %2537  ;;  %3294 = vmatprep.subr.msk.bf16.mxu0 %vm4880_vm3, %v3292_v38  ;;  %v1448_v0 = vmul.f32 %v3713_v1, %v4860_v27 }
 0x49c   : > { %v2192_v16 = vpop.xlane.xlu1 %2191  ;;  %v2388_v6 = vpop.f32.mrb[98].mxu1  ;;  %3166 = vmatprep.mubr.msk.f32.mxu1 %vm432_vm2, %v5020_v40 }
 0x49d   : > { %3722 = vrcp.f32 %v2192_v16  ;;  %v2390_v42 = vpop.f32.mrb[99].mxu1 }
 0x49e   : > { %v3715_v29 = vpop.eup %3714  ;;  %3724 = vrcp.f32 %v4935_v4 }
 0x49f   : > { %v1449_v50 = vmul.f32 %v3715_v29, %v4867_v39  ;;  %v3717_v32 = vpop.eup %3716  ;;  %3726 = vrcp.f32 %v4941_v9 }
 0x4a0   : > { %v2393_v48 = vpop.f32.mrb[100].mxu1  ;;  %v3719_v55 = vpop.eup %3718  ;;  %3728 = vrcp.f32 %v4945_v61 }
 0x4a1   : > { %v2395_v15 = vpop.f32.mrb[101].mxu1  ;;  %v3295_v59 = vpack.c.bf16 %v1449_v50, %v1448_v0  ;;  %v2520_v49 = vmul.f32 %v3717_v32, %v2393_v48  ;;  %3730 = vrcp.f32 %v4951_v3 }
 0x4a2   : > { %v3721_v37 = vpop.eup %3720  ;;  %3732 = vrcp.f32 %v4957_v43 }
 0x4a3   : > { %3297 = vmatpush3.bf16.xpose.msk.msra.mxu0 %vm4880_vm3, %v3295_v59  ;;  %v5032_v34 = vmul.f32 %v3721_v37, %v2383_v51  ;;  %3734 = vrcp.f32 %v4965_v33 }
 0x4a4   : > { %v2398_v35 = vpop.f32.mrb[102].mxu1  ;;  %3736 = vrcp.f32 %v4970_v11 }
 0x4a5   : > { %v2521_v20 = vmul.f32 %v3719_v55, %v2398_v35  ;;  %v2400_v41 = vpop.f32.mrb[103].mxu1  ;;  %3738 = vrcp.f32 %v4976_v23 }
 0x4a6   : > { %3740 = vrcp.f32 %v4982_v19 }
 0x4a7   : > { %v3723_v27 = vpop.eup %3722  ;;  %v3202_v4 = vpack.c.bf16 %v2521_v20, %v2520_v49  ;;  %3742 = vrcp.f32 %v4990_v13 }
 0x4a8   : > { %v5034_v39 = vmul.f32 %v3723_v27, %v2388_v6  ;;  %v2403_v25 = vpop.f32.mrb[104].mxu1  ;;  %v3725_v51 = vpop.eup %3724  ;;  %3744 = vrcp.f32 %v4996_v14 }
 0x4a9   : > { %v2405_v2 = vpop.f32.mrb[105].mxu1  ;;  %3204 = vmatprep.subr.msk.bf16.mxu1 %vm4880_vm3, %v3202_v4  ;;  %v3727_v61 = vpop.eup %3726  ;;  %v2522_v7 = vmul.f32 %v3725_v51, %v2403_v25  ;;  %3746 = vrcp.f32 %v5004_v5 }
 0x4aa   : > { %v3247_v9 = vpack.c.bf16 %v5034_v39, %v5032_v34  ;;  %3207 = vmatpush3.bf16.xpose.msk.msra.mxu1 %vm4880_vm3, %v3205_v60  ;;  %3201 = vmatmul.mubr.msk.f32.vlgmr.msra.gmra.mrb[130].mxu0 %vm432_vm2, %v4799_v28  ;;  %v3729_v28 = vpop.eup %3728  ;;  %3748 = vrcp.f32 %v5008_v17 }
 0x4ab   : > { %v3731_v10 = vpop.eup %3730  ;;  %3750 = vrcp.f32 %v5014_v22 }
 0x4ac   : > { %v2408_v53 = vpop.f32.mrb[106].mxu1  ;;  %v3733_v8 = vpop.eup %3732 }
 0x4ad   : > { %v2523_v38 = vmul.f32 %v3727_v61, %v2408_v53  ;;  %v2410_v16 = vpop.f32.mrb[107].mxu1  ;;  %v3735_v36 = vpop.eup %3734 }
 0x4ae   : > { %v3737_v45 = vpop.eup %3736 }
 0x4af   : > { %v3208_v6 = vpack.c.bf16 %v2523_v38, %v2522_v7  ;;  %v3739_v46 = vpop.eup %3738 }
 0x4b0   : > { %v2413_v1 = vpop.f32.mrb[108].mxu1  ;;  %v3741_v26 = vpop.eup %3740 }
 0x4b1   : > { %v2415_v3 = vpop.f32.mrb[109].mxu1  ;;  %3210 = vmatprep.subr.msk.bf16.mxu1 %vm4880_vm3, %v3208_v6  ;;  %v2524_v60 = vmul.f32 %v3729_v28, %v2413_v1  ;;  %v3743_v56 = vpop.eup %3742 }
 0x4b2   : > { %3213 = vmatpush3.bf16.xpose.msk.msra.mxu1 %vm4880_vm3, %v3211_v58  ;;  %v3745_v57 = vpop.eup %3744 }
 0x4b3   : > { %v3747_v30 = vpop.eup %3746 }
 0x4b4   : > { %v2418_v52 = vpop.f32.mrb[110].mxu1  ;;  %v3749_v47 = vpop.eup %3748 }
 0x4b5   : > { %v2525_v42 = vmul.f32 %v3731_v10, %v2418_v52  ;;  %v2420_v29 = vpop.f32.mrb[111].mxu1  ;;  %v3751_v24 = vpop.eup %3750 }
 0x4b7   : > { %v3214_v0 = vpack.c.bf16 %v2525_v42, %v2524_v60 }
 0x4b8   : > { %v2423_v43 = vpop.f32.mrb[112].mxu1 }
 0x4b9   : > { %v2425_v50 = vpop.f32.mrb[113].mxu1  ;;  %3216 = vmatprep.subr.msk.bf16.mxu1 %vm4880_vm3, %v3214_v0  ;;  %v2526_v33 = vmul.f32 %v3733_v8, %v2423_v43 }
 0x4ba   : > { %3219 = vmatpush3.bf16.xpose.msk.msra.mxu1 %vm4880_vm3, %v3217_v18 }
 0x4bc   : > { %v2428_v58 = vpop.f32.mrb[114].mxu1 }
 0x4bd   : > { %v2527_v48 = vmul.f32 %v3735_v36, %v2428_v58  ;;  %v2430_v15 = vpop.f32.mrb[115].mxu1 }
 0x4bf   : > { %v3220_v32 = vpack.c.bf16 %v2527_v48, %v2526_v33 }
 0x4c0   : > { %v2433_v11 = vpop.f32.mrb[116].mxu1 }
 0x4c1   : > { %v2435_v59 = vpop.f32.mrb[117].mxu1  ;;  %3222 = vmatprep.subr.msk.bf16.mxu1 %vm4880_vm3, %v3220_v32  ;;  %v2528_v23 = vmul.f32 %v3737_v45, %v2433_v11 }
 0x4c2   : > { %3225 = vmatpush3.bf16.xpose.msk.msra.mxu1 %vm4880_vm3, %v3223_v31 }
 0x4c4   : > { %v2438_v18 = vpop.f32.mrb[118].mxu1 }
 0x4c5   : > { %v2529_v55 = vmul.f32 %v3739_v46, %v2438_v18  ;;  %v2440_v37 = vpop.f32.mrb[119].mxu1 }
 0x4c7   : > { %v3226_v35 = vpack.c.bf16 %v2529_v55, %v2528_v23 }
 0x4c8   : > { %v2443_v19 = vpop.f32.mrb[120].mxu1 }
 0x4c9   : > { %v2445_v49 = vpop.f32.mrb[121].mxu1  ;;  %3228 = vmatprep.subr.msk.bf16.mxu1 %vm4880_vm3, %v3226_v35  ;;  %v2530_v13 = vmul.f32 %v3741_v26, %v2443_v19 }
 0x4ca   : > { %3231 = vmatpush3.bf16.xpose.msk.msra.mxu1 %vm4880_vm3, %v3229_v54 }
 0x4cc   : > { %v2448_v31 = vpop.f32.mrb[122].mxu1 }
 0x4cd   : > { %v2531_v20 = vmul.f32 %v3743_v56, %v2448_v31  ;;  %v2450_v41 = vpop.f32.mrb[123].mxu1 }
 0x4cf   : > { %v3232_v27 = vpack.c.bf16 %v2531_v20, %v2530_v13 }
 0x4d0   : > { %v2453_v14 = vpop.f32.mrb[124].mxu1 }
 0x4d1   : > { %v2455_v4 = vpop.f32.mrb[125].mxu1  ;;  %3234 = vmatprep.subr.msk.bf16.mxu1 %vm4880_vm3, %v3232_v27  ;;  %v2532_v5 = vmul.f32 %v3745_v57, %v2453_v14 }
 0x4d2   : > { %3237 = vmatpush3.bf16.xpose.msk.msra.mxu1 %vm4880_vm3, %v3235_v63 }
 0x4d4   : > { %v2458_v54 = vpop.f32.mrb[126].mxu1 }
 0x4d5   : > { %v2533_v25 = vmul.f32 %v3747_v30, %v2458_v54  ;;  %v2460_v2 = vpop.f32.mrb[127].mxu1 }
 0x4d7   : > { %v3238_v51 = vpack.c.bf16 %v2533_v25, %v2532_v5 }
 0x4d8   : > { %v2463_v17 = vpop.f32.mrb[128].mxu1 }
 0x4d9   : > { %v2465_v61 = vpop.f32.mrb[129].mxu1  ;;  %3240 = vmatprep.subr.msk.bf16.mxu1 %vm4880_vm3, %v3238_v51  ;;  %v2534_v22 = vmul.f32 %v3749_v47, %v2463_v17 }
 0x4da   : > { %3243 = vmatpush3.bf16.xpose.msk.msra.mxu1 %vm4880_vm3, %v3241_v21 }
 0x4dd   : > { %v2468_v63 = vpop.f32.mrb[130].mxu1 }
 0x4de   : > { %v2535_v53 = vmul.f32 %v3751_v24, %v2468_v63  ;;  %v2470_v7 = vpop.f32.mrb[131].mxu1 }
 0x4e0   : > { %v3244_v38 = vpack.c.bf16 %v2535_v53, %v2534_v22 }
 0x4e2   : > { %3246 = vmatprep.subr.msk.bf16.mxu1 %vm4880_vm3, %v3244_v38 }
 0x4e3   : > { %3249 = vmatpush3.bf16.xpose.msk.msra.mxu1 %vm4880_vm3, %v3247_v9 }
 0x4ea   : > { %3167 = vmatmul.mubr.msk.f32.vlgmr.msra.gmra.mrb[132].mxu1 %vm432_vm2, %v5020_v40 }
 0x57d   : > { %v2872_v44 = vpop.f32.mrb[130].mxu0 }
 0x57e   : > { %v2874_v62 = vpop.f32.mrb[131].mxu0 }
 0x5bd   : > { %v2703_v21 = vpop.f32.mrb[132].mxu1 }
 0x5be   : > { %v2873_v16 = vadd.f32 %v2872_v44, %v2703_v21  ;;  %v2705_v6 = vpop.f32.mrb[133].mxu1 }
 0x5bf   : > { %v2875_v1 = vadd.f32 %v2874_v62, %v2705_v6 }
 0x5c0   : > { %2877 = vst [vmem:[%s190_s18] sm:$0xff] %v2873_v16 }
 0x5c1   : > { %2878 = vst [vmem:[%s190_s18 + $0x8] sm:$0xff] %v2875_v1 }
 0x5c2   : > { %3793 = shalt.err (!%p3790_p6)
}
 0x5c3   : > { %s3794_s27 = scalar_lea.hbm %s5115_s28, 256  ;;  %s3798_s7 = scalar_lea.hbm %s5165_s3, 512 }
 0x5c4   : > { %p3795_p7 = scmp.ne.s32.totalorder %s5115_s28, %s3794_s27  ;;  %p3799_p0 = scmp.lt.u32.totalorder %s5115_s28, %s5165_s3 }
 0x5c5   : > { %p3800_p2 = scmp.lt.u32.totalorder %s3798_s7, %s3794_s27  ;;  %p3802_p8 = scmp.lt.u32.totalorder %s3794_s27, %s5115_s28 }
 0x5c6   : > { %p3796_p9 = pnand %p3795_p7, %p5335_p10 }
 0x5c7   : > { %p3801_p4 = por %p3800_p2, %p3799_p0 }
 0x5c8   : > { %p3797_p12 = pneg %p3796_p9 }
 0x5c9   : > { %p3803_p11 = por %p3802_p8, %p3801_p4 }
 0x5cb   : > { %p3804_p13 = pnand %p3803_p11, %p3797_p12 }
 0x5cd   : > { %3807 = shalt.err (!%p3804_p13)
}
 0x5ce   : > { %3304 = dma.vmem_to_hbm [thread:$0]  (%p5335_p10), %s5117_s19, 256, %s5115_s28, %s2880_s29  }
 0x5cf PF: > { %p3316_p1 = scmp.ge.s32.totalorder %s3862_s17, 2  ;;  %s2908_s10 = sand.u32 1, %s3842_s12  }
 0x5d0   : > { %p5336_p3 = scmp.ne.s32.totalorder %s5219_s24, 0  ;;  %s2909_s11 = scalar_lea.sflag [#allocation4], %s2908_s10 }
 0x5d2   : > { %p3311_p5 = pnand %p3316_p1, %p5336_p3 }
 0x5d4   : > { %3837 = dma.done.wait (!%p3311_p5), %s2909_s11, 256  }
 0x5d5   : > { %3839 = vsyncadd (!%p3311_p5), %s2909_s11, 4294967040  ;;  %s17_s17 = sadd.s32 1, %s3862_s17   ;;  %s5337_s12 = smov %s3846_s13 }
 0x5d6   : > { %p14_p6 = scmp.ge.s32.totalorder %s17_s17, 4   ;;  %s5338_s13 = smov %s3850_s14 }
 0x5d7   : > { %s5339_s14 = smov %s3941_s25  ;;  %s5340_s15 = smov %s3858_s16 }
 0x5d8   : > { %s5341_s16 = smov %s5343_s20  ;;  %16 = sbr.rel (!%p14_p6) target bundleno = 5 (0x5), region = 73 }
 0x5df   :  { %2914 = vsyncpa [#allocation3], 1 }
 0x5e0   :  { %2916 = vsyncpa [#allocation3 + $0x1], 1 }
 0x5e1   :  { %2917 = vsyncpa [#allocation4], 1 }
 0x5e2   :  { %2919 = vsyncpa [#allocation4 + $0x1], 1 }

</bundles_post_ra>
